<compile_context>
chip_gen: v5e
topology: v5e:2x2
jax: 0.10.0
libtpu: 0.0.40
codegen_flags: <defaults>
</compile_context>

<pallas_src>
import functools

import jax
import jax.numpy as jnp
from jax.experimental import pallas as pl
from jax.experimental.pallas import tpu as pltpu

EPS = 1e-3        # BatchNorm2d(eps=0.001)
LANES = 128       # channel block = one lane-register width


def _dwconv_bn_kernel(xp_ref, w_ref, gamma_ref, beta_ref, out_ref,
                      s_sum_ref, s_sq_ref, *, eps, band, chunk, valid_w):
    """Per 128-channel block:
         xp_ref:    (N, H+KH-1, Wp, CB)  zero-padded input       (VMEM)
         w_ref:     (KH, KW, CB)         depthwise weights       (VMEM)
         gamma_ref: (1, CB), beta_ref: (1, CB)  BN affine params (VMEM)
         out_ref:   (N, H, Wp, CB)       full padded width       (VMEM)
         s_sum_ref / s_sq_ref: (1, CB)   BN stats scratch        (VMEM)
    """
    N, H, Wp, CB = out_ref.shape
    KH, KW, _ = w_ref.shape
    n_bands = H // band
    slab_rows = band + KH - 1
    F = N * slab_rows * Wp
    cnt = float(N * H * valid_w)

    s_sum_ref[...] = jnp.zeros_like(s_sum_ref)
    s_sq_ref[...] = jnp.zeros_like(s_sq_ref)

    # Mask that zeroes the (Wp - valid_w) halo columns before stats / stores.
    col = jax.lax.broadcasted_iota(jnp.int32, (Wp, CB), 0)
    keep = col < valid_w                                   # (Wp, CB) bool

    # ---- pass 1: depthwise conv (cumulative-roll tap shifts) + BN stats ----
    @pl.loop(0, n_bands)
    def _(b):
        r0 = b * band
        # one load of the (band+KH-1)-row slab at full padded width
        slab = xp_ref[:, pl.ds(r0, slab_rows), :, :].astype(jnp.float32)
        shifted = slab.reshape(F, CB)
        acc = jnp.zeros((N, band, Wp, CB), jnp.float32)
        for kw in range(KW):
            if kw:
                # cumulative shift by -1: column (w + kw) moves to position w
                shifted = pltpu.roll(shifted, shift=F - 1, axis=0)
            sh4 = shifted.reshape(N, slab_rows, Wp, CB)
            for kh in range(KH):
                wt = w_ref[kh, kw:kw + 1, :].astype(jnp.float32)   # (1, CB)
                acc = acc + sh4[:, kh:kh + band, :, :] * wt
        conv = jnp.where(keep, acc, 0.0)                   # zero halo columns
        # full-width, tile-aligned (unmasked) store
        out_ref[:, pl.ds(r0, band), :, :] = conv.astype(out_ref.dtype)
        # fused BN statistics (halo columns contribute exact zeros)
        flat = conv.reshape(N * band * Wp, CB)
        s_sum_ref[...] += jnp.sum(flat, axis=0, keepdims=True)
        s_sq_ref[...] += jnp.sum(flat * flat, axis=0, keepdims=True)

    # ---- BatchNorm parameters from batch statistics (biased var, as torch) -
    mean = s_sum_ref[...] * (1.0 / cnt)
    var = jnp.maximum(s_sq_ref[...] * (1.0 / cnt) - mean * mean, 0.0)
    inv = jax.lax.rsqrt(var + eps)
    scale = gamma_ref[...].astype(jnp.float32) * inv        # (1, CB)
    offs = beta_ref[...].astype(jnp.float32) - mean * scale
    scale4 = scale.reshape(1, 1, 1, CB)
    offs4 = offs.reshape(1, 1, 1, CB)

    # ---- pass 2: apply affine normalization in place, chunk by chunk -------
    @pl.loop(0, H // chunk)
    def _(c):
        r0 = c * chunk
        y = out_ref[:, pl.ds(r0, chunk), :, :].astype(jnp.float32)
        out_ref[:, pl.ds(r0, chunk), :, :] = (y * scale4 + offs4).astype(out_ref.dtype)


@functools.partial(jax.jit, static_argnames=("eps",))
def depthwise_conv_bn(x_nchw, w_oihw, gamma, beta, eps=EPS):
    """x_nchw: (N, C, H, W); w_oihw: (C, 1, KH, KW); gamma/beta: (C,)."""
    N, C, H, W = x_nchw.shape
    KH, KW = int(w_oihw.shape[2]), int(w_oihw.shape[3])
    ph, pw = KH // 2, KW // 2                       # padding=(2, 2) for 5x5
    Hp = H + 2 * ph
    Wp = ((W + 2 * pw + 7) // 8) * 8                # sublane-aligned width (32)
    CB = LANES
    Cp = ((C + CB - 1) // CB) * CB                  # 480 -> 512 lane-dense blocks
    band = 2 if H % 2 == 0 else 1                   # conv-pass row band
    chunk = 4 if H % 4 == 0 else band               # normalization-pass band

    # Glue: layout change + one pad (conv halo + sublane + lane padding).
    # All of this fuses with the pallas_call under jit.
    x_nhwc = jnp.transpose(x_nchw, (0, 2, 3, 1))
    xp = jnp.pad(x_nhwc, ((0, 0), (ph, ph), (pw, Wp - W - pw), (0, Cp - C)))
    w_hwc = jnp.pad(jnp.transpose(w_oihw[:, 0, :, :], (1, 2, 0)),
                    ((0, 0), (0, 0), (0, Cp - C)))
    gamma2 = jnp.pad(gamma.astype(jnp.float32), (0, Cp - C),
                     constant_values=1.0).reshape(1, Cp)
    beta2 = jnp.pad(beta.astype(jnp.float32), (0, Cp - C)).reshape(1, Cp)

    kernel = functools.partial(_dwconv_bn_kernel, eps=eps, band=band,
                               chunk=chunk, valid_w=W)
    out_nhwc = pl.pallas_call(
        kernel,
        out_shape=jax.ShapeDtypeStruct((N, H, Wp, Cp), x_nchw.dtype),
        grid=(Cp // CB,),
        in_specs=[
            pl.BlockSpec((N, Hp, Wp, CB), lambda c: (0, 0, 0, c)),
            pl.BlockSpec((KH, KW, CB), lambda c: (0, 0, c)),
            pl.BlockSpec((1, CB), lambda c: (0, c)),
            pl.BlockSpec((1, CB), lambda c: (0, c)),
        ],
        out_specs=pl.BlockSpec((N, H, Wp, CB), lambda c: (0, 0, 0, c)),
        scratch_shapes=[pltpu.VMEM((1, CB), jnp.float32),
                        pltpu.VMEM((1, CB), jnp.float32)],
        compiler_params=pltpu.CompilerParams(
            dimension_semantics=("parallel",)),
    )(xp, w_hwc, gamma2, beta2)

    # Slice off halo columns / padded channels, back to NCHW (fused under jit).
    return jnp.transpose(out_nhwc[:, :, :W, :C], (0, 3, 1, 2))


def _ref_forward(x, w, gamma, beta, eps=EPS):
    """Pure-JAX reference (depthwise conv + training-mode batchnorm)."""
    y = jax.lax.conv_general_dilated(
        x, w, window_strides=(1, 1), padding=((2, 2), (2, 2)),
        feature_group_count=x.shape[1],
        dimension_numbers=("NCHW", "OIHW", "NCHW"))
    mean = jnp.mean(y, axis=(0, 2, 3), keepdims=True)
    var = jnp.mean((y - mean) ** 2, axis=(0, 2, 3), keepdims=True)
    g = gamma.reshape(1, -1, 1, 1)
    b = beta.reshape(1, -1, 1, 1)
    return (y - mean) / jnp.sqrt(var + eps) * g + b


if __name__ == "__main__":
    # Shapes implied by the module's forward: x212 ~ (1, 480, 28, 28).
    N, C, H, W = 1, 480, 28, 28
    KH, KW = 5, 5

    key = jax.random.PRNGKey(0)
    kx, kw_, kg, kb = jax.random.split(key, 4)

    x = jax.random.normal(kx, (N, C, H, W), jnp.float32)
    # Conv2d(480, 480, 5x5, groups=480, bias=False): weight shape (480, 1, 5, 5)
    w = jax.random.normal(kw_, (C, 1, KH, KW), jnp.float32) * (1.0 / (KH * KW))
    # BatchNorm2d affine params (non-trivial to exercise the affine path)
    gamma = 1.0 + 0.1 * jax.random.normal(kg, (C,), jnp.float32)
    beta = 0.1 * jax.random.normal(kb, (C,), jnp.float32)

    out = jax.block_until_ready(depthwise_conv_bn(x, w, gamma, beta))
    ref = jax.block_until_ready(_ref_forward(x, w, gamma, beta))

    assert out.shape == (N, C, H, W)
    assert jnp.allclose(out, ref, atol=1e-3, rtol=1e-3), "mismatch vs reference"

    print("KERNEL_OK")
</pallas_src>

<mosaic_0001>
module attributes {stable_mosaic.version = 11 : i64} {
  func.func @_dwconv_bn_kernel(%arg0: i32, %arg1: memref<1x32x32x128xf32, #tpu.memory_space<vmem>>, %arg2: memref<5x5x128xf32, #tpu.memory_space<vmem>>, %arg3: memref<1x128xf32, #tpu.memory_space<vmem>>, %arg4: memref<1x128xf32, #tpu.memory_space<vmem>>, %arg5: memref<1x28x32x128xf32, #tpu.memory_space<vmem>>, %arg6: memref<1x128xf32, #tpu.memory_space<vmem>>, %arg7: memref<1x128xf32, #tpu.memory_space<vmem>>) attributes {dimension_semantics = [#tpu.dimension_semantics<parallel>], iteration_bounds = array<i64: 4>, scalar_prefetch = 0 : i64, scratch_operands = 2 : i64, tpu.core_type = #tpu.core_type<tc>, window_params = [{transform_indices = @transform_0, window_bounds = array<i64: 1, 32, 32, 128>}, {transform_indices = @transform_1, window_bounds = array<i64: 5, 5, 128>}, {transform_indices = @transform_2, window_bounds = array<i64: 1, 128>}, {transform_indices = @transform_3, window_bounds = array<i64: 1, 128>}, {transform_indices = @transform_4, window_bounds = array<i64: 1, 28, 32, 128>}]} {
    %cst = arith.constant 0.000000e+00 : f32
    %0 = vector.broadcast %cst : f32 to vector<1x128xf32>
    %c0 = arith.constant 0 : index
    %c0_0 = arith.constant 0 : index
    %1 = vector.load %arg6[%c0, %c0_0] : memref<1x128xf32, #tpu.memory_space<vmem>>, vector<1x128xf32>
    tpu.vector_store %arg6[%c0, %c0_0], %0 {strides = array<i32>} : memref<1x128xf32, #tpu.memory_space<vmem>>, vector<1x128xf32>,
    %cst_1 = arith.constant 0.000000e+00 : f32
    %2 = vector.broadcast %cst_1 : f32 to vector<1x128xf32>
    %c0_2 = arith.constant 0 : index
    %c0_3 = arith.constant 0 : index
    %3 = vector.load %arg7[%c0_2, %c0_3] : memref<1x128xf32, #tpu.memory_space<vmem>>, vector<1x128xf32>
    tpu.vector_store %arg7[%c0_2, %c0_3], %2 {strides = array<i32>} : memref<1x128xf32, #tpu.memory_space<vmem>>, vector<1x128xf32>,
    %4 = tpu.iota {dimensions = array<i32: 0>} : vector<32x128xi32>
    %c28_i32 = arith.constant 28 : i32
    %5 = vector.broadcast %c28_i32 : i32 to vector<32x128xi32>
    %6 = arith.cmpi slt, %4, %5 : vector<32x128xi32>
    %c0_i32 = arith.constant 0 : i32
    %c14_i32 = arith.constant 14 : i32
    %7 = arith.addi %c0_i32, %c14_i32 : i32
    %c1_i32 = arith.constant 1 : i32
    scf.for %arg8 = %c0_i32 to %7 step %c1_i32  : i32 {
      %c1_i32_20 = arith.constant 1 : i32
      %29 = arith.muli %arg8, %c1_i32_20 : i32
      %c0_i32_21 = arith.constant 0 : i32
      %30 = arith.addi %c0_i32_21, %29 : i32
      %c2_i32 = arith.constant 2 : i32
      %31 = arith.muli %30, %c2_i32 : i32
      %c0_22 = arith.constant 0 : index
      %32 = arith.index_cast %31 : i32 to index
      %c0_23 = arith.constant 0 : index
      %c0_24 = arith.constant 0 : index
      %33 = vector.load %arg1[%c0_22, %32, %c0_23, %c0_24] : memref<1x32x32x128xf32, #tpu.memory_space<vmem>>, vector<1x6x32x128xf32>
      %34 = vector.shape_cast %33 : vector<1x6x32x128xf32> to vector<192x128xf32>
      %cst_25 = arith.constant 0.000000e+00 : f32
      %35 = vector.broadcast %cst_25 : f32 to vector<1x2x32x128xf32>
      %36 = vector.shape_cast %34 : vector<192x128xf32> to vector<1x6x32x128xf32>
      %c0_26 = arith.constant 0 : index
      %c0_27 = arith.constant 0 : index
      %c0_28 = arith.constant 0 : index
      %37 = vector.load %arg2[%c0_26, %c0_27, %c0_28] : memref<5x5x128xf32, #tpu.memory_space<vmem>>, vector<1x1x128xf32>
      %38 = vector.shape_cast %37 : vector<1x1x128xf32> to vector<1x128xf32>
      %39 = vector.extract_strided_slice %36 {offsets = [0, 0, 0, 0], sizes = [1, 2, 32, 128], strides = [1, 1, 1, 1]} : vector<1x6x32x128xf32> to vector<1x2x32x128xf32>
      %40 = vector.shape_cast %38 : vector<1x128xf32> to vector<1x1x1x128xf32>
      %41 = vector.broadcast %40 : vector<1x1x1x128xf32> to vector<1x2x32x128xf32>
      %42 = arith.mulf %39, %41 : vector<1x2x32x128xf32>
      %43 = arith.addf %35, %42 : vector<1x2x32x128xf32>
      %c1 = arith.constant 1 : index
      %c0_29 = arith.constant 0 : index
      %c0_30 = arith.constant 0 : index
      %44 = vector.load %arg2[%c1, %c0_29, %c0_30] : memref<5x5x128xf32, #tpu.memory_space<vmem>>, vector<1x1x128xf32>
      %45 = vector.shape_cast %44 : vector<1x1x128xf32> to vector<1x128xf32>
      %46 = vector.extract_strided_slice %36 {offsets = [0, 1, 0, 0], sizes = [1, 2, 32, 128], strides = [1, 1, 1, 1]} : vector<1x6x32x128xf32> to vector<1x2x32x128xf32>
      %47 = vector.shape_cast %45 : vector<1x128xf32> to vector<1x1x1x128xf32>
      %48 = vector.broadcast %47 : vector<1x1x1x128xf32> to vector<1x2x32x128xf32>
      %49 = arith.mulf %46, %48 : vector<1x2x32x128xf32>
      %50 = arith.addf %43, %49 : vector<1x2x32x128xf32>
      %c2 = arith.constant 2 : index
      %c0_31 = arith.constant 0 : index
      %c0_32 = arith.constant 0 : index
      %51 = vector.load %arg2[%c2, %c0_31, %c0_32] : memref<5x5x128xf32, #tpu.memory_space<vmem>>, vector<1x1x128xf32>
      %52 = vector.shape_cast %51 : vector<1x1x128xf32> to vector<1x128xf32>
      %53 = vector.extract_strided_slice %36 {offsets = [0, 2, 0, 0], sizes = [1, 2, 32, 128], strides = [1, 1, 1, 1]} : vector<1x6x32x128xf32> to vector<1x2x32x128xf32>
      %54 = vector.shape_cast %52 : vector<1x128xf32> to vector<1x1x1x128xf32>
      %55 = vector.broadcast %54 : vector<1x1x1x128xf32> to vector<1x2x32x128xf32>
      %56 = arith.mulf %53, %55 : vector<1x2x32x128xf32>
      %57 = arith.addf %50, %56 : vector<1x2x32x128xf32>
      %c3 = arith.constant 3 : index
      %c0_33 = arith.constant 0 : index
      %c0_34 = arith.constant 0 : index
      %58 = vector.load %arg2[%c3, %c0_33, %c0_34] : memref<5x5x128xf32, #tpu.memory_space<vmem>>, vector<1x1x128xf32>
      %59 = vector.shape_cast %58 : vector<1x1x128xf32> to vector<1x128xf32>
      %60 = vector.extract_strided_slice %36 {offsets = [0, 3, 0, 0], sizes = [1, 2, 32, 128], strides = [1, 1, 1, 1]} : vector<1x6x32x128xf32> to vector<1x2x32x128xf32>
      %61 = vector.shape_cast %59 : vector<1x128xf32> to vector<1x1x1x128xf32>
      %62 = vector.broadcast %61 : vector<1x1x1x128xf32> to vector<1x2x32x128xf32>
      %63 = arith.mulf %60, %62 : vector<1x2x32x128xf32>
      %64 = arith.addf %57, %63 : vector<1x2x32x128xf32>
      %c4 = arith.constant 4 : index
      %c0_35 = arith.constant 0 : index
      %c0_36 = arith.constant 0 : index
      %65 = vector.load %arg2[%c4, %c0_35, %c0_36] : memref<5x5x128xf32, #tpu.memory_space<vmem>>, vector<1x1x128xf32>
      %66 = vector.shape_cast %65 : vector<1x1x128xf32> to vector<1x128xf32>
      %67 = vector.extract_strided_slice %36 {offsets = [0, 4, 0, 0], sizes = [1, 2, 32, 128], strides = [1, 1, 1, 1]} : vector<1x6x32x128xf32> to vector<1x2x32x128xf32>
      %68 = vector.shape_cast %66 : vector<1x128xf32> to vector<1x1x1x128xf32>
      %69 = vector.broadcast %68 : vector<1x1x1x128xf32> to vector<1x2x32x128xf32>
      %70 = arith.mulf %67, %69 : vector<1x2x32x128xf32>
      %71 = arith.addf %64, %70 : vector<1x2x32x128xf32>
      %c191_i32 = arith.constant 191 : i32
      %72 = tpu.dynamic_rotate %34 by %c191_i32 dim 0 : vector<192x128xf32>, i32 -> vector<192x128xf32>
      %73 = vector.shape_cast %72 : vector<192x128xf32> to vector<1x6x32x128xf32>
      %c0_37 = arith.constant 0 : index
      %c1_38 = arith.constant 1 : index
      %c0_39 = arith.constant 0 : index
      %74 = vector.load %arg2[%c0_37, %c1_38, %c0_39] : memref<5x5x128xf32, #tpu.memory_space<vmem>>, vector<1x1x128xf32>
      %75 = vector.shape_cast %74 : vector<1x1x128xf32> to vector<1x128xf32>
      %76 = vector.extract_strided_slice %73 {offsets = [0, 0, 0, 0], sizes = [1, 2, 32, 128], strides = [1, 1, 1, 1]} : vector<1x6x32x128xf32> to vector<1x2x32x128xf32>
      %77 = vector.shape_cast %75 : vector<1x128xf32> to vector<1x1x1x128xf32>
      %78 = vector.broadcast %77 : vector<1x1x1x128xf32> to vector<1x2x32x128xf32>
      %79 = arith.mulf %76, %78 : vector<1x2x32x128xf32>
      %80 = arith.addf %71, %79 : vector<1x2x32x128xf32>
      %c1_40 = arith.constant 1 : index
      %c1_41 = arith.constant 1 : index
      %c0_42 = arith.constant 0 : index
      %81 = vector.load %arg2[%c1_40, %c1_41, %c0_42] : memref<5x5x128xf32, #tpu.memory_space<vmem>>, vector<1x1x128xf32>
      %82 = vector.shape_cast %81 : vector<1x1x128xf32> to vector<1x128xf32>
      %83 = vector.extract_strided_slice %73 {offsets = [0, 1, 0, 0], sizes = [1, 2, 32, 128], strides = [1, 1, 1, 1]} : vector<1x6x32x128xf32> to vector<1x2x32x128xf32>
      %84 = vector.shape_cast %82 : vector<1x128xf32> to vector<1x1x1x128xf32>
      %85 = vector.broadcast %84 : vector<1x1x1x128xf32> to vector<1x2x32x128xf32>
      %86 = arith.mulf %83, %85 : vector<1x2x32x128xf32>
      %87 = arith.addf %80, %86 : vector<1x2x32x128xf32>
      %c2_43 = arith.constant 2 : index
      %c1_44 = arith.constant 1 : index
      %c0_45 = arith.constant 0 : index
      %88 = vector.load %arg2[%c2_43, %c1_44, %c0_45] : memref<5x5x128xf32, #tpu.memory_space<vmem>>, vector<1x1x128xf32>
      %89 = vector.shape_cast %88 : vector<1x1x128xf32> to vector<1x128xf32>
      %90 = vector.extract_strided_slice %73 {offsets = [0, 2, 0, 0], sizes = [1, 2, 32, 128], strides = [1, 1, 1, 1]} : vector<1x6x32x128xf32> to vector<1x2x32x128xf32>
      %91 = vector.shape_cast %89 : vector<1x128xf32> to vector<1x1x1x128xf32>
      %92 = vector.broadcast %91 : vector<1x1x1x128xf32> to vector<1x2x32x128xf32>
      %93 = arith.mulf %90, %92 : vector<1x2x32x128xf32>
      %94 = arith.addf %87, %93 : vector<1x2x32x128xf32>
      %c3_46 = arith.constant 3 : index
      %c1_47 = arith.constant 1 : index
      %c0_48 = arith.constant 0 : index
      %95 = vector.load %arg2[%c3_46, %c1_47, %c0_48] : memref<5x5x128xf32, #tpu.memory_space<vmem>>, vector<1x1x128xf32>
      %96 = vector.shape_cast %95 : vector<1x1x128xf32> to vector<1x128xf32>
      %97 = vector.extract_strided_slice %73 {offsets = [0, 3, 0, 0], sizes = [1, 2, 32, 128], strides = [1, 1, 1, 1]} : vector<1x6x32x128xf32> to vector<1x2x32x128xf32>
      %98 = vector.shape_cast %96 : vector<1x128xf32> to vector<1x1x1x128xf32>
      %99 = vector.broadcast %98 : vector<1x1x1x128xf32> to vector<1x2x32x128xf32>
      %100 = arith.mulf %97, %99 : vector<1x2x32x128xf32>
      %101 = arith.addf %94, %100 : vector<1x2x32x128xf32>
      %c4_49 = arith.constant 4 : index
      %c1_50 = arith.constant 1 : index
      %c0_51 = arith.constant 0 : index
      %102 = vector.load %arg2[%c4_49, %c1_50, %c0_51] : memref<5x5x128xf32, #tpu.memory_space<vmem>>, vector<1x1x128xf32>
      %103 = vector.shape_cast %102 : vector<1x1x128xf32> to vector<1x128xf32>
      %104 = vector.extract_strided_slice %73 {offsets = [0, 4, 0, 0], sizes = [1, 2, 32, 128], strides = [1, 1, 1, 1]} : vector<1x6x32x128xf32> to vector<1x2x32x128xf32>
      %105 = vector.shape_cast %103 : vector<1x128xf32> to vector<1x1x1x128xf32>
      %106 = vector.broadcast %105 : vector<1x1x1x128xf32> to vector<1x2x32x128xf32>
      %107 = arith.mulf %104, %106 : vector<1x2x32x128xf32>
      %108 = arith.addf %101, %107 : vector<1x2x32x128xf32>
      %c191_i32_52 = arith.constant 191 : i32
      %109 = tpu.dynamic_rotate %72 by %c191_i32_52 dim 0 : vector<192x128xf32>, i32 -> vector<192x128xf32>
      %110 = vector.shape_cast %109 : vector<192x128xf32> to vector<1x6x32x128xf32>
      %c0_53 = arith.constant 0 : index
      %c2_54 = arith.constant 2 : index
      %c0_55 = arith.constant 0 : index
      %111 = vector.load %arg2[%c0_53, %c2_54, %c0_55] : memref<5x5x128xf32, #tpu.memory_space<vmem>>, vector<1x1x128xf32>
      %112 = vector.shape_cast %111 : vector<1x1x128xf32> to vector<1x128xf32>
      %113 = vector.extract_strided_slice %110 {offsets = [0, 0, 0, 0], sizes = [1, 2, 32, 128], strides = [1, 1, 1, 1]} : vector<1x6x32x128xf32> to vector<1x2x32x128xf32>
      %114 = vector.shape_cast %112 : vector<1x128xf32> to vector<1x1x1x128xf32>
      %115 = vector.broadcast %114 : vector<1x1x1x128xf32> to vector<1x2x32x128xf32>
      %116 = arith.mulf %113, %115 : vector<1x2x32x128xf32>
      %117 = arith.addf %108, %116 : vector<1x2x32x128xf32>
      %c1_56 = arith.constant 1 : index
      %c2_57 = arith.constant 2 : index
      %c0_58 = arith.constant 0 : index
      %118 = vector.load %arg2[%c1_56, %c2_57, %c0_58] : memref<5x5x128xf32, #tpu.memory_space<vmem>>, vector<1x1x128xf32>
      %119 = vector.shape_cast %118 : vector<1x1x128xf32> to vector<1x128xf32>
      %120 = vector.extract_strided_slice %110 {offsets = [0, 1, 0, 0], sizes = [1, 2, 32, 128], strides = [1, 1, 1, 1]} : vector<1x6x32x128xf32> to vector<1x2x32x128xf32>
      %121 = vector.shape_cast %119 : vector<1x128xf32> to vector<1x1x1x128xf32>
      %122 = vector.broadcast %121 : vector<1x1x1x128xf32> to vector<1x2x32x128xf32>
      %123 = arith.mulf %120, %122 : vector<1x2x32x128xf32>
      %124 = arith.addf %117, %123 : vector<1x2x32x128xf32>
      %c2_59 = arith.constant 2 : index
      %c2_60 = arith.constant 2 : index
      %c0_61 = arith.constant 0 : index
      %125 = vector.load %arg2[%c2_59, %c2_60, %c0_61] : memref<5x5x128xf32, #tpu.memory_space<vmem>>, vector<1x1x128xf32>
      %126 = vector.shape_cast %125 : vector<1x1x128xf32> to vector<1x128xf32>
      %127 = vector.extract_strided_slice %110 {offsets = [0, 2, 0, 0], sizes = [1, 2, 32, 128], strides = [1, 1, 1, 1]} : vector<1x6x32x128xf32> to vector<1x2x32x128xf32>
      %128 = vector.shape_cast %126 : vector<1x128xf32> to vector<1x1x1x128xf32>
      %129 = vector.broadcast %128 : vector<1x1x1x128xf32> to vector<1x2x32x128xf32>
      %130 = arith.mulf %127, %129 : vector<1x2x32x128xf32>
      %131 = arith.addf %124, %130 : vector<1x2x32x128xf32>
      %c3_62 = arith.constant 3 : index
      %c2_63 = arith.constant 2 : index
      %c0_64 = arith.constant 0 : index
      %132 = vector.load %arg2[%c3_62, %c2_63, %c0_64] : memref<5x5x128xf32, #tpu.memory_space<vmem>>, vector<1x1x128xf32>
      %133 = vector.shape_cast %132 : vector<1x1x128xf32> to vector<1x128xf32>
      %134 = vector.extract_strided_slice %110 {offsets = [0, 3, 0, 0], sizes = [1, 2, 32, 128], strides = [1, 1, 1, 1]} : vector<1x6x32x128xf32> to vector<1x2x32x128xf32>
      %135 = vector.shape_cast %133 : vector<1x128xf32> to vector<1x1x1x128xf32>
      %136 = vector.broadcast %135 : vector<1x1x1x128xf32> to vector<1x2x32x128xf32>
      %137 = arith.mulf %134, %136 : vector<1x2x32x128xf32>
      %138 = arith.addf %131, %137 : vector<1x2x32x128xf32>
      %c4_65 = arith.constant 4 : index
      %c2_66 = arith.constant 2 : index
      %c0_67 = arith.constant 0 : index
      %139 = vector.load %arg2[%c4_65, %c2_66, %c0_67] : memref<5x5x128xf32, #tpu.memory_space<vmem>>, vector<1x1x128xf32>
      %140 = vector.shape_cast %139 : vector<1x1x128xf32> to vector<1x128xf32>
      %141 = vector.extract_strided_slice %110 {offsets = [0, 4, 0, 0], sizes = [1, 2, 32, 128], strides = [1, 1, 1, 1]} : vector<1x6x32x128xf32> to vector<1x2x32x128xf32>
      %142 = vector.shape_cast %140 : vector<1x128xf32> to vector<1x1x1x128xf32>
      %143 = vector.broadcast %142 : vector<1x1x1x128xf32> to vector<1x2x32x128xf32>
      %144 = arith.mulf %141, %143 : vector<1x2x32x128xf32>
      %145 = arith.addf %138, %144 : vector<1x2x32x128xf32>
      %c191_i32_68 = arith.constant 191 : i32
      %146 = tpu.dynamic_rotate %109 by %c191_i32_68 dim 0 : vector<192x128xf32>, i32 -> vector<192x128xf32>
      %147 = vector.shape_cast %146 : vector<192x128xf32> to vector<1x6x32x128xf32>
      %c0_69 = arith.constant 0 : index
      %c3_70 = arith.constant 3 : index
      %c0_71 = arith.constant 0 : index
      %148 = vector.load %arg2[%c0_69, %c3_70, %c0_71] : memref<5x5x128xf32, #tpu.memory_space<vmem>>, vector<1x1x128xf32>
      %149 = vector.shape_cast %148 : vector<1x1x128xf32> to vector<1x128xf32>
      %150 = vector.extract_strided_slice %147 {offsets = [0, 0, 0, 0], sizes = [1, 2, 32, 128], strides = [1, 1, 1, 1]} : vector<1x6x32x128xf32> to vector<1x2x32x128xf32>
      %151 = vector.shape_cast %149 : vector<1x128xf32> to vector<1x1x1x128xf32>
      %152 = vector.broadcast %151 : vector<1x1x1x128xf32> to vector<1x2x32x128xf32>
      %153 = arith.mulf %150, %152 : vector<1x2x32x128xf32>
      %154 = arith.addf %145, %153 : vector<1x2x32x128xf32>
      %c1_72 = arith.constant 1 : index
      %c3_73 = arith.constant 3 : index
      %c0_74 = arith.constant 0 : index
      %155 = vector.load %arg2[%c1_72, %c3_73, %c0_74] : memref<5x5x128xf32, #tpu.memory_space<vmem>>, vector<1x1x128xf32>
      %156 = vector.shape_cast %155 : vector<1x1x128xf32> to vector<1x128xf32>
      %157 = vector.extract_strided_slice %147 {offsets = [0, 1, 0, 0], sizes = [1, 2, 32, 128], strides = [1, 1, 1, 1]} : vector<1x6x32x128xf32> to vector<1x2x32x128xf32>
      %158 = vector.shape_cast %156 : vector<1x128xf32> to vector<1x1x1x128xf32>
      %159 = vector.broadcast %158 : vector<1x1x1x128xf32> to vector<1x2x32x128xf32>
      %160 = arith.mulf %157, %159 : vector<1x2x32x128xf32>
      %161 = arith.addf %154, %160 : vector<1x2x32x128xf32>
      %c2_75 = arith.constant 2 : index
      %c3_76 = arith.constant 3 : index
      %c0_77 = arith.constant 0 : index
      %162 = vector.load %arg2[%c2_75, %c3_76, %c0_77] : memref<5x5x128xf32, #tpu.memory_space<vmem>>, vector<1x1x128xf32>
      %163 = vector.shape_cast %162 : vector<1x1x128xf32> to vector<1x128xf32>
      %164 = vector.extract_strided_slice %147 {offsets = [0, 2, 0, 0], sizes = [1, 2, 32, 128], strides = [1, 1, 1, 1]} : vector<1x6x32x128xf32> to vector<1x2x32x128xf32>
      %165 = vector.shape_cast %163 : vector<1x128xf32> to vector<1x1x1x128xf32>
      %166 = vector.broadcast %165 : vector<1x1x1x128xf32> to vector<1x2x32x128xf32>
      %167 = arith.mulf %164, %166 : vector<1x2x32x128xf32>
      %168 = arith.addf %161, %167 : vector<1x2x32x128xf32>
      %c3_78 = arith.constant 3 : index
      %c3_79 = arith.constant 3 : index
      %c0_80 = arith.constant 0 : index
      %169 = vector.load %arg2[%c3_78, %c3_79, %c0_80] : memref<5x5x128xf32, #tpu.memory_space<vmem>>, vector<1x1x128xf32>
      %170 = vector.shape_cast %169 : vector<1x1x128xf32> to vector<1x128xf32>
      %171 = vector.extract_strided_slice %147 {offsets = [0, 3, 0, 0], sizes = [1, 2, 32, 128], strides = [1, 1, 1, 1]} : vector<1x6x32x128xf32> to vector<1x2x32x128xf32>
      %172 = vector.shape_cast %170 : vector<1x128xf32> to vector<1x1x1x128xf32>
      %173 = vector.broadcast %172 : vector<1x1x1x128xf32> to vector<1x2x32x128xf32>
      %174 = arith.mulf %171, %173 : vector<1x2x32x128xf32>
      %175 = arith.addf %168, %174 : vector<1x2x32x128xf32>
      %c4_81 = arith.constant 4 : index
      %c3_82 = arith.constant 3 : index
      %c0_83 = arith.constant 0 : index
      %176 = vector.load %arg2[%c4_81, %c3_82, %c0_83] : memref<5x5x128xf32, #tpu.memory_space<vmem>>, vector<1x1x128xf32>
      %177 = vector.shape_cast %176 : vector<1x1x128xf32> to vector<1x128xf32>
      %178 = vector.extract_strided_slice %147 {offsets = [0, 4, 0, 0], sizes = [1, 2, 32, 128], strides = [1, 1, 1, 1]} : vector<1x6x32x128xf32> to vector<1x2x32x128xf32>
      %179 = vector.shape_cast %177 : vector<1x128xf32> to vector<1x1x1x128xf32>
      %180 = vector.broadcast %179 : vector<1x1x1x128xf32> to vector<1x2x32x128xf32>
      %181 = arith.mulf %178, %180 : vector<1x2x32x128xf32>
      %182 = arith.addf %175, %181 : vector<1x2x32x128xf32>
      %c191_i32_84 = arith.constant 191 : i32
      %183 = tpu.dynamic_rotate %146 by %c191_i32_84 dim 0 : vector<192x128xf32>, i32 -> vector<192x128xf32>
      %184 = vector.shape_cast %183 : vector<192x128xf32> to vector<1x6x32x128xf32>
      %c0_85 = arith.constant 0 : index
      %c4_86 = arith.constant 4 : index
      %c0_87 = arith.constant 0 : index
      %185 = vector.load %arg2[%c0_85, %c4_86, %c0_87] : memref<5x5x128xf32, #tpu.memory_space<vmem>>, vector<1x1x128xf32>
      %186 = vector.shape_cast %185 : vector<1x1x128xf32> to vector<1x128xf32>
      %187 = vector.extract_strided_slice %184 {offsets = [0, 0, 0, 0], sizes = [1, 2, 32, 128], strides = [1, 1, 1, 1]} : vector<1x6x32x128xf32> to vector<1x2x32x128xf32>
      %188 = vector.shape_cast %186 : vector<1x128xf32> to vector<1x1x1x128xf32>
      %189 = vector.broadcast %188 : vector<1x1x1x128xf32> to vector<1x2x32x128xf32>
      %190 = arith.mulf %187, %189 : vector<1x2x32x128xf32>
      %191 = arith.addf %182, %190 : vector<1x2x32x128xf32>
      %c1_88 = arith.constant 1 : index
      %c4_89 = arith.constant 4 : index
      %c0_90 = arith.constant 0 : index
      %192 = vector.load %arg2[%c1_88, %c4_89, %c0_90] : memref<5x5x128xf32, #tpu.memory_space<vmem>>, vector<1x1x128xf32>
      %193 = vector.shape_cast %192 : vector<1x1x128xf32> to vector<1x128xf32>
      %194 = vector.extract_strided_slice %184 {offsets = [0, 1, 0, 0], sizes = [1, 2, 32, 128], strides = [1, 1, 1, 1]} : vector<1x6x32x128xf32> to vector<1x2x32x128xf32>
      %195 = vector.shape_cast %193 : vector<1x128xf32> to vector<1x1x1x128xf32>
      %196 = vector.broadcast %195 : vector<1x1x1x128xf32> to vector<1x2x32x128xf32>
      %197 = arith.mulf %194, %196 : vector<1x2x32x128xf32>
      %198 = arith.addf %191, %197 : vector<1x2x32x128xf32>
      %c2_91 = arith.constant 2 : index
      %c4_92 = arith.constant 4 : index
      %c0_93 = arith.constant 0 : index
      %199 = vector.load %arg2[%c2_91, %c4_92, %c0_93] : memref<5x5x128xf32, #tpu.memory_space<vmem>>, vector<1x1x128xf32>
      %200 = vector.shape_cast %199 : vector<1x1x128xf32> to vector<1x128xf32>
      %201 = vector.extract_strided_slice %184 {offsets = [0, 2, 0, 0], sizes = [1, 2, 32, 128], strides = [1, 1, 1, 1]} : vector<1x6x32x128xf32> to vector<1x2x32x128xf32>
      %202 = vector.shape_cast %200 : vector<1x128xf32> to vector<1x1x1x128xf32>
      %203 = vector.broadcast %202 : vector<1x1x1x128xf32> to vector<1x2x32x128xf32>
      %204 = arith.mulf %201, %203 : vector<1x2x32x128xf32>
      %205 = arith.addf %198, %204 : vector<1x2x32x128xf32>
      %c3_94 = arith.constant 3 : index
      %c4_95 = arith.constant 4 : index
      %c0_96 = arith.constant 0 : index
      %206 = vector.load %arg2[%c3_94, %c4_95, %c0_96] : memref<5x5x128xf32, #tpu.memory_space<vmem>>, vector<1x1x128xf32>
      %207 = vector.shape_cast %206 : vector<1x1x128xf32> to vector<1x128xf32>
      %208 = vector.extract_strided_slice %184 {offsets = [0, 3, 0, 0], sizes = [1, 2, 32, 128], strides = [1, 1, 1, 1]} : vector<1x6x32x128xf32> to vector<1x2x32x128xf32>
      %209 = vector.shape_cast %207 : vector<1x128xf32> to vector<1x1x1x128xf32>
      %210 = vector.broadcast %209 : vector<1x1x1x128xf32> to vector<1x2x32x128xf32>
      %211 = arith.mulf %208, %210 : vector<1x2x32x128xf32>
      %212 = arith.addf %205, %211 : vector<1x2x32x128xf32>
      %c4_97 = arith.constant 4 : index
      %c4_98 = arith.constant 4 : index
      %c0_99 = arith.constant 0 : index
      %213 = vector.load %arg2[%c4_97, %c4_98, %c0_99] : memref<5x5x128xf32, #tpu.memory_space<vmem>>, vector<1x1x128xf32>
      %214 = vector.shape_cast %213 : vector<1x1x128xf32> to vector<1x128xf32>
      %215 = vector.extract_strided_slice %184 {offsets = [0, 4, 0, 0], sizes = [1, 2, 32, 128], strides = [1, 1, 1, 1]} : vector<1x6x32x128xf32> to vector<1x2x32x128xf32>
      %216 = vector.shape_cast %214 : vector<1x128xf32> to vector<1x1x1x128xf32>
      %217 = vector.broadcast %216 : vector<1x1x1x128xf32> to vector<1x2x32x128xf32>
      %218 = arith.mulf %215, %217 : vector<1x2x32x128xf32>
      %219 = arith.addf %212, %218 : vector<1x2x32x128xf32>
      %cst_100 = arith.constant 0.000000e+00 : f32
      %220 = vector.shape_cast %6 : vector<32x128xi1> to vector<1x1x32x128xi1>
      %221 = vector.broadcast %220 : vector<1x1x32x128xi1> to vector<1x2x32x128xi1>
      %222 = vector.broadcast %cst_100 : f32 to vector<1x2x32x128xf32>
      %223 = arith.select %221, %219, %222 : vector<1x2x32x128xi1>, vector<1x2x32x128xf32>
      %c0_101 = arith.constant 0 : index
      %224 = arith.index_cast %31 : i32 to index
      %c0_102 = arith.constant 0 : index
      %c0_103 = arith.constant 0 : index
      %225 = vector.load %arg5[%c0_101, %224, %c0_102, %c0_103] : memref<1x28x32x128xf32, #tpu.memory_space<vmem>>, vector<1x2x32x128xf32>
      tpu.vector_store %arg5[%c0_101, %224, %c0_102, %c0_103], %223 {strides = array<i32>} : memref<1x28x32x128xf32, #tpu.memory_space<vmem>>, vector<1x2x32x128xf32>,
      %226 = vector.shape_cast %223 : vector<1x2x32x128xf32> to vector<64x128xf32>
      %c0_104 = arith.constant 0 : index
      %c0_105 = arith.constant 0 : index
      %227 = vector.load %arg6[%c0_104, %c0_105] : memref<1x128xf32, #tpu.memory_space<vmem>>, vector<1x128xf32>
      %cst_106 = arith.constant dense<0.000000e+00> : vector<128xf32>
      %228 = vector.multi_reduction <add>, %226, %cst_106 [0] : vector<64x128xf32> to vector<128xf32>
      %229 = vector.shape_cast %228 : vector<128xf32> to vector<1x128xf32>
      %230 = arith.addf %227, %229 : vector<1x128xf32>
      %c0_107 = arith.constant 0 : index
      %c0_108 = arith.constant 0 : index
      %231 = vector.load %arg6[%c0_107, %c0_108] : memref<1x128xf32, #tpu.memory_space<vmem>>, vector<1x128xf32>
      tpu.vector_store %arg6[%c0_107, %c0_108], %230 {strides = array<i32>} : memref<1x128xf32, #tpu.memory_space<vmem>>, vector<1x128xf32>,
      %c0_109 = arith.constant 0 : index
      %c0_110 = arith.constant 0 : index
      %232 = vector.load %arg7[%c0_109, %c0_110] : memref<1x128xf32, #tpu.memory_space<vmem>>, vector<1x128xf32>
      %233 = arith.mulf %226, %226 : vector<64x128xf32>
      %cst_111 = arith.constant dense<0.000000e+00> : vector<128xf32>
      %234 = vector.multi_reduction <add>, %233, %cst_111 [0] : vector<64x128xf32> to vector<128xf32>
      %235 = vector.shape_cast %234 : vector<128xf32> to vector<1x128xf32>
      %236 = arith.addf %232, %235 : vector<1x128xf32>
      %c0_112 = arith.constant 0 : index
      %c0_113 = arith.constant 0 : index
      %237 = vector.load %arg7[%c0_112, %c0_113] : memref<1x128xf32, #tpu.memory_space<vmem>>, vector<1x128xf32>
      tpu.vector_store %arg7[%c0_112, %c0_113], %236 {strides = array<i32>} : memref<1x128xf32, #tpu.memory_space<vmem>>, vector<1x128xf32>,
    }
    %c14_i32_4 = arith.constant 14 : i32
    %c0_5 = arith.constant 0 : index
    %c0_6 = arith.constant 0 : index
    %8 = vector.load %arg6[%c0_5, %c0_6] : memref<1x128xf32, #tpu.memory_space<vmem>>, vector<1x128xf32>
    %cst_7 = arith.constant 0.00127551018 : f32
    %9 = vector.broadcast %cst_7 : f32 to vector<1x128xf32>
    %10 = arith.mulf %8, %9 : vector<1x128xf32>
    %c0_8 = arith.constant 0 : index
    %c0_9 = arith.constant 0 : index
    %11 = vector.load %arg7[%c0_8, %c0_9] : memref<1x128xf32, #tpu.memory_space<vmem>>, vector<1x128xf32>
    %cst_10 = arith.constant 0.00127551018 : f32
    %12 = vector.broadcast %cst_10 : f32 to vector<1x128xf32>
    %13 = arith.mulf %11, %12 : vector<1x128xf32>
    %14 = arith.mulf %10, %10 : vector<1x128xf32>
    %15 = arith.subf %13, %14 : vector<1x128xf32>
    %cst_11 = arith.constant 0.000000e+00 : f32
    %16 = vector.broadcast %cst_11 : f32 to vector<1x128xf32>
    %17 = arith.maximumf %15, %16 : vector<1x128xf32>
    %cst_12 = arith.constant 1.000000e-03 : f32
    %18 = vector.broadcast %cst_12 : f32 to vector<1x128xf32>
    %19 = arith.addf %17, %18 : vector<1x128xf32>
    %20 = math.rsqrt %19 : vector<1x128xf32>
    %c0_13 = arith.constant 0 : index
    %c0_14 = arith.constant 0 : index
    %21 = vector.load %arg3[%c0_13, %c0_14] : memref<1x128xf32, #tpu.memory_space<vmem>>, vector<1x128xf32>
    %22 = arith.mulf %21, %20 : vector<1x128xf32>
    %c0_15 = arith.constant 0 : index
    %c0_16 = arith.constant 0 : index
    %23 = vector.load %arg4[%c0_15, %c0_16] : memref<1x128xf32, #tpu.memory_space<vmem>>, vector<1x128xf32>
    %24 = arith.mulf %10, %22 : vector<1x128xf32>
    %25 = arith.subf %23, %24 : vector<1x128xf32>
    %26 = vector.shape_cast %22 : vector<1x128xf32> to vector<1x1x1x128xf32>
    %27 = vector.shape_cast %25 : vector<1x128xf32> to vector<1x1x1x128xf32>
    %c0_i32_17 = arith.constant 0 : i32
    %c7_i32 = arith.constant 7 : i32
    %28 = arith.addi %c0_i32_17, %c7_i32 : i32
    %c1_i32_18 = arith.constant 1 : i32
    scf.for %arg8 = %c0_i32_17 to %28 step %c1_i32_18  : i32 {
      %c1_i32_20 = arith.constant 1 : i32
      %29 = arith.muli %arg8, %c1_i32_20 : i32
      %c0_i32_21 = arith.constant 0 : i32
      %30 = arith.addi %c0_i32_21, %29 : i32
      %c4_i32 = arith.constant 4 : i32
      %31 = arith.muli %30, %c4_i32 : i32
      %c0_22 = arith.constant 0 : index
      %32 = arith.index_cast %31 : i32 to index
      %c0_23 = arith.constant 0 : index
      %c0_24 = arith.constant 0 : index
      %33 = vector.load %arg5[%c0_22, %32, %c0_23, %c0_24] : memref<1x28x32x128xf32, #tpu.memory_space<vmem>>, vector<1x4x32x128xf32>
      %34 = vector.broadcast %26 : vector<1x1x1x128xf32> to vector<1x4x32x128xf32>
      %35 = arith.mulf %33, %34 : vector<1x4x32x128xf32>
      %36 = vector.broadcast %27 : vector<1x1x1x128xf32> to vector<1x4x32x128xf32>
      %37 = arith.addf %35, %36 : vector<1x4x32x128xf32>
      %c0_25 = arith.constant 0 : index
      %38 = arith.index_cast %31 : i32 to index
      %c0_26 = arith.constant 0 : index
      %c0_27 = arith.constant 0 : index
      %39 = vector.load %arg5[%c0_25, %38, %c0_26, %c0_27] : memref<1x28x32x128xf32, #tpu.memory_space<vmem>>, vector<1x4x32x128xf32>
      tpu.vector_store %arg5[%c0_25, %38, %c0_26, %c0_27], %37 {strides = array<i32>} : memref<1x28x32x128xf32, #tpu.memory_space<vmem>>, vector<1x4x32x128xf32>,
    }
    %c7_i32_19 = arith.constant 7 : i32
    return
  }
  func.func @transform_0(%arg0: i32) -> (i32, i32, i32, i32) {
    %c0_i32 = arith.constant 0 : i32
    %c0_i32_0 = arith.constant 0 : i32
    %c0_i32_1 = arith.constant 0 : i32
    %c0_i32_2 = arith.constant 0 : i32
    return %c0_i32, %c0_i32_0, %c0_i32_1, %arg0 : i32, i32, i32, i32
  }
  func.func @transform_1(%arg0: i32) -> (i32, i32, i32) {
    %c0_i32 = arith.constant 0 : i32
    %c0_i32_0 = arith.constant 0 : i32
    %c0_i32_1 = arith.constant 0 : i32
    return %c0_i32, %c0_i32_0, %arg0 : i32, i32, i32
  }
  func.func @transform_2(%arg0: i32) -> (i32, i32) {
    %c0_i32 = arith.constant 0 : i32
    %c0_i32_0 = arith.constant 0 : i32
    return %c0_i32, %arg0 : i32, i32
  }
  func.func @transform_3(%arg0: i32) -> (i32, i32) {
    %c0_i32 = arith.constant 0 : i32
    %c0_i32_0 = arith.constant 0 : i32
    return %c0_i32, %arg0 : i32, i32
  }
  func.func @transform_4(%arg0: i32) -> (i32, i32, i32, i32) {
    %c0_i32 = arith.constant 0 : i32
    %c0_i32_0 = arith.constant 0 : i32
    %c0_i32_1 = arith.constant 0 : i32
    %c0_i32_2 = arith.constant 0 : i32
    return %c0_i32, %c0_i32_0, %c0_i32_1, %arg0 : i32, i32, i32, i32
  }
}

</mosaic_0001>

<bundles_post_ra>
// kernel: depthwise_conv_bn.1
= control target key start
LH: loop header
LB: loop body
LE: loop exit
PB: predicated region body
PF: predicated region fallthrough
CT: control target
= control target key end

     0   :  { %s2461_s15 = smov 0   ;;  %s2463_s16 = smov 0   ;;  %s3957_s0 = inlined_call_operand.vmem [shape: f32[1,32,32,512], index: 0, kind: input, shape index: {}]   ;;  %s3958_s1 = inlined_call_operand.vmem [shape: f32[5,5,512], index: 1, kind: input, shape index: {}]   ;;  %s3959_s2 = inlined_call_operand.vmem [shape: f32[1,512], index: 2, kind: input, shape index: {}]   ;;  %s3960_s3 = inlined_call_operand.vmem [shape: f32[1,512], index: 3, kind: input, shape index: {}]   ;;  %s3961_s4 = inlined_call_operand.vmem [shape: f32[1,28,32,512], index: 4, kind: output, shape index: {}]  }
   0x1   :  { %s2465_s17 = smov 0  }
   0x2 LB: > { %s2477_s18 = sadd.s32 4294967295, %s2425_s17   ;;  %s2480_s19 = sadd.s32 1, %s2425_s17   ;;  %s2425_s17 = sphi %s2465_s17, %s3966_s17   ;;  %s2421_s16 = sphi %s2463_s16, %s3965_s16   ;;  %s2417_s15 = sphi %s2461_s15, %s3964_s15  }
   0x3   : > { %s18_s20 = ssub.s32 %s2425_s17, %s2480_s19  ;;  %s21_s21 = sadd.s32 1, %s2421_s16 }
   0x4   : > { %p19_p0 = scmp.eq.s32.totalorder %s18_s20, 0  ;;  %p28_p1 = scmp.ne.s32.totalorder %s2421_s16, %s2417_s15 }
   0x5   : > { %p29_p2 = scmp.eq.s32.totalorder %s2425_s17, 0  ;;  %p136_p3 = scmp.eq.s32.totalorder %s2477_s18, 3 }
   0x6   : > { %s2490_s22 = scalar_select %p19_p0, %s2421_s16, %s21_s21  }
   0x7   : > { %p2492_p4 = por %p29_p2, %p28_p1  ;;  %p2496_p5 = por %p136_p3, %p28_p1 }
   0x8   : > { %p2289_p6 = scmp.ge.s32.totalorder %s2425_s17, 4 }
   0xa   : > { %158 = sbr.rel (%p2289_p6) target bundleno = 156 (0x9c), region = 16 }
   0xf   : > { %161 = sbr.rel (!%p2492_p4) target bundleno = 147 (0x93), region = 20  ;;  %s163_s25 = sand.u32 (%p2492_p4), 1, %s2421_s16  }
  0x10   : > { %s2291_s26 = sshll.u32 (%p2492_p4), %s2425_s17, 3  ;;  %s2290_s27 = sshll.u32 (%p2492_p4), %s163_s25, 10 }
  0x11   : > { %s2508_s30 = scalar_lea.vmem (%p2492_p4), %s3957_s0, %s2291_s26  ;;  %s2513_s5 = scalar_lea.vmem (%p2492_p4), [#allocation4], %s2290_s27 }
  0x12   : > { %v450_v0 = vld [vmem:[%s2508_s30] sm:$0xff] (%p2492_p4) }
  0x13   : > { %v452_v1 = vld [vmem:[%s2508_s30 + $0x20] sm:$0xff] (%p2492_p4)  ;;  %451 = vst [vmem:[%s2513_s5] sm:$0xff] (%p2492_p4), %v450_v0 }
  0x14   : > { %v454_v2 = vld [vmem:[%s2508_s30 + $0x40] sm:$0xff]  ;;  %453 = vst [vmem:[%s2513_s5 + $0x8] sm:$0xff] %v452_v1 }
  0x15   : > { %v456_v3 = vld [vmem:[%s2508_s30 + $0x60] sm:$0xff]  ;;  %455 = vst [vmem:[%s2513_s5 + $0x10] sm:$0xff] %v454_v2 }
  0x16   : > { %v458_v4 = vld [vmem:[%s2508_s30 + $0x80] sm:$0xff]  ;;  %457 = vst [vmem:[%s2513_s5 + $0x18] sm:$0xff] %v456_v3 }
  0x17   : > { %v460_v5 = vld [vmem:[%s2508_s30 + $0xa0] sm:$0xff]  ;;  %459 = vst [vmem:[%s2513_s5 + $0x20] sm:$0xff] %v458_v4 }
  0x18   : > { %v462_v6 = vld [vmem:[%s2508_s30 + $0xc0] sm:$0xff]  ;;  %461 = vst [vmem:[%s2513_s5 + $0x28] sm:$0xff] %v460_v5 }
  0x19   : > { %v464_v7 = vld [vmem:[%s2508_s30 + $0xe0] sm:$0xff]  ;;  %463 = vst [vmem:[%s2513_s5 + $0x30] sm:$0xff] %v462_v6 }
  0x1a   : > { %v466_v8 = vld [vmem:[%s2508_s30 + $0x100] sm:$0xff]  ;;  %465 = vst [vmem:[%s2513_s5 + $0x38] sm:$0xff] %v464_v7 }
  0x1b   : > { %v468_v9 = vld [vmem:[%s2508_s30 + $0x120] sm:$0xff]  ;;  %467 = vst [vmem:[%s2513_s5 + $0x40] sm:$0xff] %v466_v8 }
  0x1c   : > { %v470_v10 = vld [vmem:[%s2508_s30 + $0x140] sm:$0xff]  ;;  %469 = vst [vmem:[%s2513_s5 + $0x48] sm:$0xff] %v468_v9 }
  0x1d   : > { %v472_v11 = vld [vmem:[%s2508_s30 + $0x160] sm:$0xff]  ;;  %471 = vst [vmem:[%s2513_s5 + $0x50] sm:$0xff] %v470_v10 }
  0x1e   : > { %v474_v12 = vld [vmem:[%s2508_s30 + $0x180] sm:$0xff]  ;;  %473 = vst [vmem:[%s2513_s5 + $0x58] sm:$0xff] %v472_v11 }
  0x1f   : > { %v476_v13 = vld [vmem:[%s2508_s30 + $0x1a0] sm:$0xff]  ;;  %475 = vst [vmem:[%s2513_s5 + $0x60] sm:$0xff] %v474_v12 }
  0x20   : > { %v478_v14 = vld [vmem:[%s2508_s30 + $0x1c0] sm:$0xff]  ;;  %477 = vst [vmem:[%s2513_s5 + $0x68] sm:$0xff] %v476_v13 }
  0x21   : > { %v480_v15 = vld [vmem:[%s2508_s30 + $0x1e0] sm:$0xff]  ;;  %479 = vst [vmem:[%s2513_s5 + $0x70] sm:$0xff] %v478_v14 }
  0x22   : > { %v482_v16 = vld [vmem:[%s2508_s30 + $0x200] sm:$0xff]  ;;  %481 = vst [vmem:[%s2513_s5 + $0x78] sm:$0xff] %v480_v15 }
  0x23   : > { %v484_v17 = vld [vmem:[%s2508_s30 + $0x220] sm:$0xff]  ;;  %483 = vst [vmem:[%s2513_s5 + $0x80] sm:$0xff] %v482_v16 }
  0x24   : > { %v486_v18 = vld [vmem:[%s2508_s30 + $0x240] sm:$0xff]  ;;  %485 = vst [vmem:[%s2513_s5 + $0x88] sm:$0xff] %v484_v17 }
  0x25   : > { %v488_v19 = vld [vmem:[%s2508_s30 + $0x260] sm:$0xff]  ;;  %487 = vst [vmem:[%s2513_s5 + $0x90] sm:$0xff] %v486_v18 }
  0x26   : > { %v490_v20 = vld [vmem:[%s2508_s30 + $0x280] sm:$0xff]  ;;  %489 = vst [vmem:[%s2513_s5 + $0x98] sm:$0xff] %v488_v19 }
  0x27   : > { %v492_v21 = vld [vmem:[%s2508_s30 + $0x2a0] sm:$0xff]  ;;  %491 = vst [vmem:[%s2513_s5 + $0xa0] sm:$0xff] %v490_v20 }
  0x28   : > { %v494_v22 = vld [vmem:[%s2508_s30 + $0x2c0] sm:$0xff]  ;;  %493 = vst [vmem:[%s2513_s5 + $0xa8] sm:$0xff] %v492_v21 }
  0x29   : > { %v496_v23 = vld [vmem:[%s2508_s30 + $0x2e0] sm:$0xff]  ;;  %495 = vst [vmem:[%s2513_s5 + $0xb0] sm:$0xff] %v494_v22 }
  0x2a   : > { %v498_v24 = vld [vmem:[%s2508_s30 + $0x300] sm:$0xff]  ;;  %497 = vst [vmem:[%s2513_s5 + $0xb8] sm:$0xff] %v496_v23 }
  0x2b   : > { %v500_v25 = vld [vmem:[%s2508_s30 + $0x320] sm:$0xff]  ;;  %499 = vst [vmem:[%s2513_s5 + $0xc0] sm:$0xff] %v498_v24 }
  0x2c   : > { %v502_v26 = vld [vmem:[%s2508_s30 + $0x340] sm:$0xff]  ;;  %501 = vst [vmem:[%s2513_s5 + $0xc8] sm:$0xff] %v500_v25 }
  0x2d   : > { %v504_v27 = vld [vmem:[%s2508_s30 + $0x360] sm:$0xff]  ;;  %503 = vst [vmem:[%s2513_s5 + $0xd0] sm:$0xff] %v502_v26 }
  0x2e   : > { %v506_v28 = vld [vmem:[%s2508_s30 + $0x380] sm:$0xff]  ;;  %505 = vst [vmem:[%s2513_s5 + $0xd8] sm:$0xff] %v504_v27 }
  0x2f   : > { %v508_v29 = vld [vmem:[%s2508_s30 + $0x3a0] sm:$0xff]  ;;  %507 = vst [vmem:[%s2513_s5 + $0xe0] sm:$0xff] %v506_v28 }
  0x30   : > { %v510_v30 = vld [vmem:[%s2508_s30 + $0x3c0] sm:$0xff]  ;;  %509 = vst [vmem:[%s2513_s5 + $0xe8] sm:$0xff] %v508_v29 }
  0x31   : > { %v512_v31 = vld [vmem:[%s2508_s30 + $0x3e0] sm:$0xff]  ;;  %511 = vst [vmem:[%s2513_s5 + $0xf0] sm:$0xff] %v510_v30 }
  0x32   : > { %v514_v32 = vld [vmem:[%s2508_s30 + $0x400] sm:$0xff]  ;;  %513 = vst [vmem:[%s2513_s5 + $0xf8] sm:$0xff] %v512_v31 }
  0x33   : > { %v516_v33 = vld [vmem:[%s2508_s30 + $0x420] sm:$0xff]  ;;  %515 = vst [vmem:[%s2513_s5 + $0x100] sm:$0xff] %v514_v32 }
  0x34   : > { %v518_v34 = vld [vmem:[%s2508_s30 + $0x440] sm:$0xff]  ;;  %517 = vst [vmem:[%s2513_s5 + $0x108] sm:$0xff] %v516_v33 }
  0x35   : > { %v520_v35 = vld [vmem:[%s2508_s30 + $0x460] sm:$0xff]  ;;  %519 = vst [vmem:[%s2513_s5 + $0x110] sm:$0xff] %v518_v34 }
  0x36   : > { %v522_v36 = vld [vmem:[%s2508_s30 + $0x480] sm:$0xff]  ;;  %521 = vst [vmem:[%s2513_s5 + $0x118] sm:$0xff] %v520_v35 }
  0x37   : > { %v524_v37 = vld [vmem:[%s2508_s30 + $0x4a0] sm:$0xff]  ;;  %523 = vst [vmem:[%s2513_s5 + $0x120] sm:$0xff] %v522_v36 }
  0x38   : > { %v526_v38 = vld [vmem:[%s2508_s30 + $0x4c0] sm:$0xff]  ;;  %525 = vst [vmem:[%s2513_s5 + $0x128] sm:$0xff] %v524_v37 }
  0x39   : > { %v528_v39 = vld [vmem:[%s2508_s30 + $0x4e0] sm:$0xff]  ;;  %527 = vst [vmem:[%s2513_s5 + $0x130] sm:$0xff] %v526_v38 }
  0x3a   : > { %v530_v40 = vld [vmem:[%s2508_s30 + $0x500] sm:$0xff]  ;;  %529 = vst [vmem:[%s2513_s5 + $0x138] sm:$0xff] %v528_v39 }
  0x3b   : > { %v532_v41 = vld [vmem:[%s2508_s30 + $0x520] sm:$0xff]  ;;  %531 = vst [vmem:[%s2513_s5 + $0x140] sm:$0xff] %v530_v40 }
  0x3c   : > { %v534_v42 = vld [vmem:[%s2508_s30 + $0x540] sm:$0xff]  ;;  %533 = vst [vmem:[%s2513_s5 + $0x148] sm:$0xff] %v532_v41 }
  0x3d   : > { %v536_v43 = vld [vmem:[%s2508_s30 + $0x560] sm:$0xff]  ;;  %535 = vst [vmem:[%s2513_s5 + $0x150] sm:$0xff] %v534_v42 }
  0x3e   : > { %v538_v44 = vld [vmem:[%s2508_s30 + $0x580] sm:$0xff]  ;;  %537 = vst [vmem:[%s2513_s5 + $0x158] sm:$0xff] %v536_v43 }
  0x3f   : > { %v540_v45 = vld [vmem:[%s2508_s30 + $0x5a0] sm:$0xff]  ;;  %539 = vst [vmem:[%s2513_s5 + $0x160] sm:$0xff] %v538_v44 }
  0x40   : > { %v542_v46 = vld [vmem:[%s2508_s30 + $0x5c0] sm:$0xff]  ;;  %541 = vst [vmem:[%s2513_s5 + $0x168] sm:$0xff] %v540_v45 }
  0x41   : > { %v544_v47 = vld [vmem:[%s2508_s30 + $0x5e0] sm:$0xff]  ;;  %543 = vst [vmem:[%s2513_s5 + $0x170] sm:$0xff] %v542_v46 }
  0x42   : > { %v546_v48 = vld [vmem:[%s2508_s30 + $0x600] sm:$0xff]  ;;  %545 = vst [vmem:[%s2513_s5 + $0x178] sm:$0xff] %v544_v47 }
  0x43   : > { %v548_v49 = vld [vmem:[%s2508_s30 + $0x620] sm:$0xff]  ;;  %547 = vst [vmem:[%s2513_s5 + $0x180] sm:$0xff] %v546_v48 }
  0x44   : > { %v550_v50 = vld [vmem:[%s2508_s30 + $0x640] sm:$0xff]  ;;  %549 = vst [vmem:[%s2513_s5 + $0x188] sm:$0xff] %v548_v49 }
  0x45   : > { %v552_v51 = vld [vmem:[%s2508_s30 + $0x660] sm:$0xff]  ;;  %551 = vst [vmem:[%s2513_s5 + $0x190] sm:$0xff] %v550_v50 }
  0x46   : > { %v554_v52 = vld [vmem:[%s2508_s30 + $0x680] sm:$0xff]  ;;  %553 = vst [vmem:[%s2513_s5 + $0x198] sm:$0xff] %v552_v51 }
  0x47   : > { %v556_v53 = vld [vmem:[%s2508_s30 + $0x6a0] sm:$0xff]  ;;  %555 = vst [vmem:[%s2513_s5 + $0x1a0] sm:$0xff] %v554_v52 }
  0x48   : > { %v558_v54 = vld [vmem:[%s2508_s30 + $0x6c0] sm:$0xff]  ;;  %557 = vst [vmem:[%s2513_s5 + $0x1a8] sm:$0xff] %v556_v53 }
  0x49   : > { %v560_v55 = vld [vmem:[%s2508_s30 + $0x6e0] sm:$0xff]  ;;  %559 = vst [vmem:[%s2513_s5 + $0x1b0] sm:$0xff] %v558_v54 }
  0x4a   : > { %v562_v56 = vld [vmem:[%s2508_s30 + $0x700] sm:$0xff]  ;;  %561 = vst [vmem:[%s2513_s5 + $0x1b8] sm:$0xff] %v560_v55 }
  0x4b   : > { %v564_v57 = vld [vmem:[%s2508_s30 + $0x720] sm:$0xff]  ;;  %563 = vst [vmem:[%s2513_s5 + $0x1c0] sm:$0xff] %v562_v56 }
  0x4c   : > { %v566_v58 = vld [vmem:[%s2508_s30 + $0x740] sm:$0xff]  ;;  %565 = vst [vmem:[%s2513_s5 + $0x1c8] sm:$0xff] %v564_v57 }
  0x4d   : > { %v568_v59 = vld [vmem:[%s2508_s30 + $0x760] sm:$0xff]  ;;  %567 = vst [vmem:[%s2513_s5 + $0x1d0] sm:$0xff] %v566_v58 }
  0x4e   : > { %v570_v60 = vld [vmem:[%s2508_s30 + $0x780] sm:$0xff]  ;;  %569 = vst [vmem:[%s2513_s5 + $0x1d8] sm:$0xff] %v568_v59 }
  0x4f   : > { %v572_v61 = vld [vmem:[%s2508_s30 + $0x7a0] sm:$0xff]  ;;  %571 = vst [vmem:[%s2513_s5 + $0x1e0] sm:$0xff] %v570_v60 }
  0x50   : > { %v574_v62 = vld [vmem:[%s2508_s30 + $0x7c0] sm:$0xff]  ;;  %573 = vst [vmem:[%s2513_s5 + $0x1e8] sm:$0xff] %v572_v61 }
  0x51   : > { %v576_v63 = vld [vmem:[%s2508_s30 + $0x7e0] sm:$0xff]  ;;  %575 = vst [vmem:[%s2513_s5 + $0x1f0] sm:$0xff] %v574_v62 }
  0x52   : > { %v578_v0 = vld [vmem:[%s2508_s30 + $0x800] sm:$0xff]  ;;  %577 = vst [vmem:[%s2513_s5 + $0x1f8] sm:$0xff] %v576_v63 }
  0x53   : > { %v580_v1 = vld [vmem:[%s2508_s30 + $0x820] sm:$0xff]  ;;  %579 = vst [vmem:[%s2513_s5 + $0x200] sm:$0xff] %v578_v0 }
  0x54   : > { %v582_v2 = vld [vmem:[%s2508_s30 + $0x840] sm:$0xff]  ;;  %581 = vst [vmem:[%s2513_s5 + $0x208] sm:$0xff] %v580_v1 }
  0x55   : > { %v584_v3 = vld [vmem:[%s2508_s30 + $0x860] sm:$0xff]  ;;  %583 = vst [vmem:[%s2513_s5 + $0x210] sm:$0xff] %v582_v2 }
  0x56   : > { %v586_v4 = vld [vmem:[%s2508_s30 + $0x880] sm:$0xff]  ;;  %585 = vst [vmem:[%s2513_s5 + $0x218] sm:$0xff] %v584_v3 }
  0x57   : > { %v588_v5 = vld [vmem:[%s2508_s30 + $0x8a0] sm:$0xff]  ;;  %587 = vst [vmem:[%s2513_s5 + $0x220] sm:$0xff] %v586_v4 }
  0x58   : > { %v590_v6 = vld [vmem:[%s2508_s30 + $0x8c0] sm:$0xff]  ;;  %589 = vst [vmem:[%s2513_s5 + $0x228] sm:$0xff] %v588_v5 }
  0x59   : > { %v592_v7 = vld [vmem:[%s2508_s30 + $0x8e0] sm:$0xff]  ;;  %591 = vst [vmem:[%s2513_s5 + $0x230] sm:$0xff] %v590_v6 }
  0x5a   : > { %v594_v8 = vld [vmem:[%s2508_s30 + $0x900] sm:$0xff]  ;;  %593 = vst [vmem:[%s2513_s5 + $0x238] sm:$0xff] %v592_v7 }
  0x5b   : > { %v596_v9 = vld [vmem:[%s2508_s30 + $0x920] sm:$0xff]  ;;  %595 = vst [vmem:[%s2513_s5 + $0x240] sm:$0xff] %v594_v8 }
  0x5c   : > { %v598_v10 = vld [vmem:[%s2508_s30 + $0x940] sm:$0xff]  ;;  %597 = vst [vmem:[%s2513_s5 + $0x248] sm:$0xff] %v596_v9 }
  0x5d   : > { %v600_v11 = vld [vmem:[%s2508_s30 + $0x960] sm:$0xff]  ;;  %599 = vst [vmem:[%s2513_s5 + $0x250] sm:$0xff] %v598_v10 }
  0x5e   : > { %v602_v12 = vld [vmem:[%s2508_s30 + $0x980] sm:$0xff]  ;;  %601 = vst [vmem:[%s2513_s5 + $0x258] sm:$0xff] %v600_v11 }
  0x5f   : > { %v604_v13 = vld [vmem:[%s2508_s30 + $0x9a0] sm:$0xff]  ;;  %603 = vst [vmem:[%s2513_s5 + $0x260] sm:$0xff] %v602_v12 }
  0x60   : > { %v606_v14 = vld [vmem:[%s2508_s30 + $0x9c0] sm:$0xff]  ;;  %605 = vst [vmem:[%s2513_s5 + $0x268] sm:$0xff] %v604_v13 }
  0x61   : > { %v608_v15 = vld [vmem:[%s2508_s30 + $0x9e0] sm:$0xff]  ;;  %607 = vst [vmem:[%s2513_s5 + $0x270] sm:$0xff] %v606_v14 }
  0x62   : > { %v610_v16 = vld [vmem:[%s2508_s30 + $0xa00] sm:$0xff]  ;;  %609 = vst [vmem:[%s2513_s5 + $0x278] sm:$0xff] %v608_v15 }
  0x63   : > { %v612_v17 = vld [vmem:[%s2508_s30 + $0xa20] sm:$0xff]  ;;  %611 = vst [vmem:[%s2513_s5 + $0x280] sm:$0xff] %v610_v16 }
  0x64   : > { %v614_v18 = vld [vmem:[%s2508_s30 + $0xa40] sm:$0xff]  ;;  %613 = vst [vmem:[%s2513_s5 + $0x288] sm:$0xff] %v612_v17 }
  0x65   : > { %v616_v19 = vld [vmem:[%s2508_s30 + $0xa60] sm:$0xff]  ;;  %615 = vst [vmem:[%s2513_s5 + $0x290] sm:$0xff] %v614_v18 }
  0x66   : > { %v618_v20 = vld [vmem:[%s2508_s30 + $0xa80] sm:$0xff]  ;;  %617 = vst [vmem:[%s2513_s5 + $0x298] sm:$0xff] %v616_v19 }
  0x67   : > { %v620_v21 = vld [vmem:[%s2508_s30 + $0xaa0] sm:$0xff]  ;;  %619 = vst [vmem:[%s2513_s5 + $0x2a0] sm:$0xff] %v618_v20 }
  0x68   : > { %v622_v22 = vld [vmem:[%s2508_s30 + $0xac0] sm:$0xff]  ;;  %621 = vst [vmem:[%s2513_s5 + $0x2a8] sm:$0xff] %v620_v21 }
  0x69   : > { %v624_v23 = vld [vmem:[%s2508_s30 + $0xae0] sm:$0xff]  ;;  %623 = vst [vmem:[%s2513_s5 + $0x2b0] sm:$0xff] %v622_v22 }
  0x6a   : > { %v626_v24 = vld [vmem:[%s2508_s30 + $0xb00] sm:$0xff]  ;;  %625 = vst [vmem:[%s2513_s5 + $0x2b8] sm:$0xff] %v624_v23 }
  0x6b   : > { %v628_v25 = vld [vmem:[%s2508_s30 + $0xb20] sm:$0xff]  ;;  %627 = vst [vmem:[%s2513_s5 + $0x2c0] sm:$0xff] %v626_v24 }
  0x6c   : > { %v630_v26 = vld [vmem:[%s2508_s30 + $0xb40] sm:$0xff]  ;;  %629 = vst [vmem:[%s2513_s5 + $0x2c8] sm:$0xff] %v628_v25 }
  0x6d   : > { %v632_v27 = vld [vmem:[%s2508_s30 + $0xb60] sm:$0xff]  ;;  %631 = vst [vmem:[%s2513_s5 + $0x2d0] sm:$0xff] %v630_v26 }
  0x6e   : > { %v634_v28 = vld [vmem:[%s2508_s30 + $0xb80] sm:$0xff]  ;;  %633 = vst [vmem:[%s2513_s5 + $0x2d8] sm:$0xff] %v632_v27 }
  0x6f   : > { %v636_v29 = vld [vmem:[%s2508_s30 + $0xba0] sm:$0xff]  ;;  %635 = vst [vmem:[%s2513_s5 + $0x2e0] sm:$0xff] %v634_v28 }
  0x70   : > { %v638_v30 = vld [vmem:[%s2508_s30 + $0xbc0] sm:$0xff]  ;;  %637 = vst [vmem:[%s2513_s5 + $0x2e8] sm:$0xff] %v636_v29 }
  0x71   : > { %v640_v31 = vld [vmem:[%s2508_s30 + $0xbe0] sm:$0xff]  ;;  %639 = vst [vmem:[%s2513_s5 + $0x2f0] sm:$0xff] %v638_v30 }
  0x72   : > { %v642_v32 = vld [vmem:[%s2508_s30 + $0xc00] sm:$0xff]  ;;  %641 = vst [vmem:[%s2513_s5 + $0x2f8] sm:$0xff] %v640_v31 }
  0x73   : > { %v644_v33 = vld [vmem:[%s2508_s30 + $0xc20] sm:$0xff]  ;;  %643 = vst [vmem:[%s2513_s5 + $0x300] sm:$0xff] %v642_v32 }
  0x74   : > { %v646_v34 = vld [vmem:[%s2508_s30 + $0xc40] sm:$0xff]  ;;  %645 = vst [vmem:[%s2513_s5 + $0x308] sm:$0xff] %v644_v33 }
  0x75   : > { %v648_v35 = vld [vmem:[%s2508_s30 + $0xc60] sm:$0xff]  ;;  %647 = vst [vmem:[%s2513_s5 + $0x310] sm:$0xff] %v646_v34 }
  0x76   : > { %v650_v36 = vld [vmem:[%s2508_s30 + $0xc80] sm:$0xff]  ;;  %649 = vst [vmem:[%s2513_s5 + $0x318] sm:$0xff] %v648_v35 }
  0x77   : > { %v652_v37 = vld [vmem:[%s2508_s30 + $0xca0] sm:$0xff]  ;;  %651 = vst [vmem:[%s2513_s5 + $0x320] sm:$0xff] %v650_v36 }
  0x78   : > { %v654_v38 = vld [vmem:[%s2508_s30 + $0xcc0] sm:$0xff]  ;;  %653 = vst [vmem:[%s2513_s5 + $0x328] sm:$0xff] %v652_v37 }
  0x79   : > { %v656_v39 = vld [vmem:[%s2508_s30 + $0xce0] sm:$0xff]  ;;  %655 = vst [vmem:[%s2513_s5 + $0x330] sm:$0xff] %v654_v38 }
  0x7a   : > { %v658_v40 = vld [vmem:[%s2508_s30 + $0xd00] sm:$0xff]  ;;  %657 = vst [vmem:[%s2513_s5 + $0x338] sm:$0xff] %v656_v39 }
  0x7b   : > { %v660_v41 = vld [vmem:[%s2508_s30 + $0xd20] sm:$0xff]  ;;  %659 = vst [vmem:[%s2513_s5 + $0x340] sm:$0xff] %v658_v40 }
  0x7c   : > { %v662_v42 = vld [vmem:[%s2508_s30 + $0xd40] sm:$0xff]  ;;  %661 = vst [vmem:[%s2513_s5 + $0x348] sm:$0xff] %v660_v41 }
  0x7d   : > { %v664_v43 = vld [vmem:[%s2508_s30 + $0xd60] sm:$0xff]  ;;  %663 = vst [vmem:[%s2513_s5 + $0x350] sm:$0xff] %v662_v42 }
  0x7e   : > { %v666_v44 = vld [vmem:[%s2508_s30 + $0xd80] sm:$0xff]  ;;  %665 = vst [vmem:[%s2513_s5 + $0x358] sm:$0xff] %v664_v43 }
  0x7f   : > { %v668_v45 = vld [vmem:[%s2508_s30 + $0xda0] sm:$0xff]  ;;  %667 = vst [vmem:[%s2513_s5 + $0x360] sm:$0xff] %v666_v44 }
  0x80   : > { %v670_v46 = vld [vmem:[%s2508_s30 + $0xdc0] sm:$0xff]  ;;  %669 = vst [vmem:[%s2513_s5 + $0x368] sm:$0xff] %v668_v45 }
  0x81   : > { %v672_v47 = vld [vmem:[%s2508_s30 + $0xde0] sm:$0xff]  ;;  %671 = vst [vmem:[%s2513_s5 + $0x370] sm:$0xff] %v670_v46 }
  0x82   : > { %v674_v48 = vld [vmem:[%s2508_s30 + $0xe00] sm:$0xff]  ;;  %673 = vst [vmem:[%s2513_s5 + $0x378] sm:$0xff] %v672_v47 }
  0x83   : > { %v676_v49 = vld [vmem:[%s2508_s30 + $0xe20] sm:$0xff]  ;;  %675 = vst [vmem:[%s2513_s5 + $0x380] sm:$0xff] %v674_v48 }
  0x84   : > { %v678_v50 = vld [vmem:[%s2508_s30 + $0xe40] sm:$0xff]  ;;  %677 = vst [vmem:[%s2513_s5 + $0x388] sm:$0xff] %v676_v49 }
  0x85   : > { %v680_v51 = vld [vmem:[%s2508_s30 + $0xe60] sm:$0xff]  ;;  %679 = vst [vmem:[%s2513_s5 + $0x390] sm:$0xff] %v678_v50 }
  0x86   : > { %v682_v52 = vld [vmem:[%s2508_s30 + $0xe80] sm:$0xff]  ;;  %681 = vst [vmem:[%s2513_s5 + $0x398] sm:$0xff] %v680_v51 }
  0x87   : > { %v684_v53 = vld [vmem:[%s2508_s30 + $0xea0] sm:$0xff]  ;;  %683 = vst [vmem:[%s2513_s5 + $0x3a0] sm:$0xff] %v682_v52 }
  0x88   : > { %v686_v54 = vld [vmem:[%s2508_s30 + $0xec0] sm:$0xff]  ;;  %685 = vst [vmem:[%s2513_s5 + $0x3a8] sm:$0xff] %v684_v53 }
  0x89   : > { %v688_v55 = vld [vmem:[%s2508_s30 + $0xee0] sm:$0xff]  ;;  %687 = vst [vmem:[%s2513_s5 + $0x3b0] sm:$0xff] %v686_v54 }
  0x8a   : > { %v690_v56 = vld [vmem:[%s2508_s30 + $0xf00] sm:$0xff]  ;;  %689 = vst [vmem:[%s2513_s5 + $0x3b8] sm:$0xff] %v688_v55 }
  0x8b   : > { %v692_v57 = vld [vmem:[%s2508_s30 + $0xf20] sm:$0xff]  ;;  %691 = vst [vmem:[%s2513_s5 + $0x3c0] sm:$0xff] %v690_v56 }
  0x8c   : > { %v694_v58 = vld [vmem:[%s2508_s30 + $0xf40] sm:$0xff]  ;;  %693 = vst [vmem:[%s2513_s5 + $0x3c8] sm:$0xff] %v692_v57 }
  0x8d   : > { %v696_v59 = vld [vmem:[%s2508_s30 + $0xf60] sm:$0xff]  ;;  %695 = vst [vmem:[%s2513_s5 + $0x3d0] sm:$0xff] %v694_v58 }
  0x8e   : > { %v698_v60 = vld [vmem:[%s2508_s30 + $0xf80] sm:$0xff]  ;;  %697 = vst [vmem:[%s2513_s5 + $0x3d8] sm:$0xff] %v696_v59 }
  0x8f   : > { %v700_v61 = vld [vmem:[%s2508_s30 + $0xfa0] sm:$0xff]  ;;  %699 = vst [vmem:[%s2513_s5 + $0x3e0] sm:$0xff] %v698_v60 }
  0x90   : > { %v702_v62 = vld [vmem:[%s2508_s30 + $0xfc0] sm:$0xff]  ;;  %701 = vst [vmem:[%s2513_s5 + $0x3e8] sm:$0xff] %v700_v61 }
  0x91   : > { %v704_v63 = vld [vmem:[%s2508_s30 + $0xfe0] sm:$0xff]  ;;  %703 = vst [vmem:[%s2513_s5 + $0x3f0] sm:$0xff] %v702_v62 }
  0x92   : > { %705 = vst [vmem:[%s2513_s5 + $0x3f8] sm:$0xff] %v704_v63 }
  0x93 PF: > { %711 = sbr.rel (!%p2492_p4) target bundleno = 156 (0x9c), region = 58  ;;  %s713_s6 = sand.u32 (%p2492_p4), 1, %s2421_s16  }
  0x94   : > { %s2292_s7 = sshll.u32 (%p2492_p4), %s2425_s17, 3  ;;  %s2324_s8 = smul.u32 (%p2492_p4), 40, %s713_s6 }
  0x95   : > { %s717_s11 = scalar_lea.vmem (%p2492_p4), %s3958_s1, %s2292_s7 }
  0x96   : > { %v754_v0 = vld [vmem:[%s717_s11] sm:$0xff] (%p2492_p4)  ;;  %s715_s12 = scalar_lea.vmem (%p2492_p4), [#allocation5], %s2324_s8 }
  0x97   : > { %v756_v1 = vld [vmem:[%s717_s11 + $0x20] sm:$0xff] (%p2492_p4)  ;;  %755 = vst [vmem:[%s715_s12] sm:$0xff] (%p2492_p4), %v754_v0 }
  0x98   : > { %v758_v2 = vld [vmem:[%s717_s11 + $0x40] sm:$0xff]  ;;  %757 = vst [vmem:[%s715_s12 + $0x8] sm:$0xff] %v756_v1 }
  0x99   : > { %v760_v3 = vld [vmem:[%s717_s11 + $0x60] sm:$0xff]  ;;  %759 = vst [vmem:[%s715_s12 + $0x10] sm:$0xff] %v758_v2 }
  0x9a   : > { %v762_v4 = vld [vmem:[%s717_s11 + $0x80] sm:$0xff]  ;;  %761 = vst [vmem:[%s715_s12 + $0x18] sm:$0xff] %v760_v3 }
  0x9b   : > { %763 = vst [vmem:[%s715_s12 + $0x20] sm:$0xff] %v762_v4 }
  0x9c PF: > { %p2293_p7 = scmp.ge.s32.totalorder %s2425_s17, 1  ;;  %p780_p8 = scmp.lt.s32.totalorder %s2425_s17, 5 }
  0x9e   : > { %p781_p9 = pnand %p2293_p7, %p780_p8 }
  0x9f   : > { %s787_s13 = sand.u32 (!%p781_p9), 1, %s2417_s15   ;;  %p828_p10 = scmp.lt.s32.totalorder (!%p781_p9), %s2477_s18, 3 }
  0xa0   : > { %784 = sbr.rel (%p781_p9) target bundleno = 531 (0x213), region = 104  ;;  %s2294_s14 = sshll.u32 (!%p781_p9), %s787_s13, 10 }
  0xa1   : > { %s2325_s20 = smul.u32 (!%p781_p9), 40, %s787_s13  ;;  %s2796_s29 = scalar_lea.vmem (!%p781_p9), [#allocation4], %s2294_s14 }
  0xa2   : > { %s2326_s21 = smul.u32 (!%p781_p9), 896, %s787_s13  ;;  %s2802_s6 = smov (!%p781_p9), 0  }
  0xa3   : > { %s2798_s30 = scalar_lea.vmem (!%p781_p9), [#allocation5], %s2325_s20 }
  0xa4   : > { %s2800_s5 = scalar_lea.vmem (!%p781_p9), [#allocation6], %s2326_s21 }
  0xa5   : > { %v836_v5 = vlaneseq  ;;  %v2435_v6 = vmov 0.0   ;;  %s2785_s17 = scalar_select %p828_p10, %s2477_s18, 3 }
  0xa6   : > { %834 = vst [vmem:[#allocation2] sm:$0x1] %v2435_v6 }
  0xa7   : > { %835 = vst [vmem:[#allocation3] sm:$0x1] %v2435_v6  ;;  %v2779_v7 = vshrl.u32 %v836_v5, 7  ;;  %s830_s25 = scalar_lea.vmem %s3959_s2, %s2785_s17  ;;  %s833_s28 = scalar_lea.vmem %s3960_s3, %s2785_s17 }
  0xa9   : > { %v2782_v8 = vadd.s32 24, %v2779_v7 }
  0xab   : > { %vm844_vm0 = vcmp.lt.s32.totalorder %v2782_v8, 28 }
  0xac LB: >> { %v2368_v9 = vld [vmem:[%s2798_s30] ss:$0 sm:$0xff]  ;;  %s2322_s7 = sshll.u32 %s2429_s6, 6  ;;  %v2369_v10 = vld [vmem:[%s2798_s30 + $0x8] ss:$0 sm:$0xff]  ;;  %vm996_vm1 = vcmp.lt.s32.totalorder %v2779_v7, 7  ;;  %s2429_s6 = sphi %s2802_s6, %s850_s6  }
  0xad   : >> { %s2813_s8 = scalar_lea.vmem %s2796_s29, %s2322_s7 [#allocation4]  ;;  %v2370_v27 = vld [vmem:[%s2798_s30 + $0x10] ss:$0 sm:$0xff]  ;;  %v2371_v48 = vld [vmem:[%s2798_s30 + $0x18] ss:$0 sm:$0xff]  ;;  %v2372_v4 = vld [vmem:[%s2798_s30 + $0x20] ss:$0 sm:$0xff]  ;;  %s3629_s9 = scalar_lea.vmem %s2800_s5, %s2322_s7 [#allocation6] }
  0xae   : >> { %v2816_v11 = vld [vmem:[%s2813_s8] sm:$0xff]  ;;  %v2819_v12 = vld [vmem:[%s2813_s8 + $0x8] sm:$0xff]  ;;  %v2822_v13 = vld [vmem:[%s2813_s8 + $0x10] sm:$0xff]  ;;  %s850_s6 = sadd.s32 1, %s2429_s6  }
  0xaf   : >> { %v2825_v14 = vld [vmem:[%s2813_s8 + $0x18] sm:$0xff]  ;;  %v2828_v15 = vld [vmem:[%s2813_s8 + $0x20] sm:$0xff]  ;;  %v2831_v16 = vld [vmem:[%s2813_s8 + $0x28] sm:$0xff]  ;;  %v880_v17 = vmul.f32 %v2368_v9, %v2816_v11  ;;  %v881_v18 = vmul.f32 %v2368_v9, %v2819_v12  ;;  %v882_v19 = vmul.f32 %v2368_v9, %v2822_v13  ;;  %v972_v20 = vrot.slane %v2816_v11, 1  ;;  %p847_p11 = scmp.ge.s32.totalorder %s850_s6, 14  }
  0xb0   : >> { %v2838_v21 = vld [vmem:[%s2813_s8 + $0x30] sm:$0xff]  ;;  %v2841_v22 = vld [vmem:[%s2813_s8 + $0x38] sm:$0xff]  ;;  %v883_v23 = vmul.f32 %v2368_v9, %v2825_v14  ;;  %v884_v24 = vmul.f32 %v2368_v9, %v2828_v15  ;;  %v885_v25 = vmul.f32 %v2368_v9, %v2831_v16  ;;  %v899_v26 = vmul.f32 %v2369_v10, %v2828_v15  ;;  %v2849_v28 = vld [vmem:[%s2813_s8 + $0x40] sm:$0xff]  ;;  %s3667_s14 = smov (%p847_p11), 0  }
  0xb1   : >> { %v2852_v29 = vld [vmem:[%s2813_s8 + $0x48] sm:$0xff]  ;;  %v2855_v30 = vld [vmem:[%s2813_s8 + $0x50] sm:$0xff]  ;;  %v886_v31 = vmul.f32 %v2368_v9, %v2838_v21  ;;  %v887_v32 = vmul.f32 %v2368_v9, %v2841_v22  ;;  %v900_v33 = vmul.f32 %v2369_v10, %v2831_v16  ;;  %v901_v34 = vmul.f32 %v2369_v10, %v2838_v21  ;;  %v2862_v35 = vld [vmem:[%s2813_s8 + $0x58] sm:$0xff] }
  0xb2   : >> { %v902_v36 = vmul.f32 %v2369_v10, %v2841_v22  ;;  %v903_v37 = vmul.f32 %v2369_v10, %v2849_v28  ;;  %v904_v38 = vmul.f32 %v2369_v10, %v2852_v29  ;;  %v905_v39 = vmul.f32 %v2369_v10, %v2855_v30  ;;  %v2871_v49 = vld [vmem:[%s2813_s8 + $0x60] sm:$0xff]  ;;  %v2874_v50 = vld [vmem:[%s2813_s8 + $0x68] sm:$0xff]  ;;  %v2877_v51 = vld [vmem:[%s2813_s8 + $0x70] sm:$0xff] }
  0xb3   : >> { %v906_v40 = vmul.f32 %v2369_v10, %v2862_v35  ;;  %v907_v41 = vadd.f32 %v899_v26, %v880_v17  ;;  %v908_v42 = vadd.f32 %v900_v33, %v881_v18  ;;  %v909_v43 = vadd.f32 %v901_v34, %v882_v19  ;;  %v2883_v56 = vld [vmem:[%s2813_s8 + $0x78] sm:$0xff]  ;;  %v2890_v61 = vld [vmem:[%s2813_s8 + $0x80] sm:$0xff]  ;;  %v2893_v62 = vld [vmem:[%s2813_s8 + $0x88] sm:$0xff] }
  0xb4   : >> { %v910_v44 = vadd.f32 %v902_v36, %v883_v23  ;;  %v911_v45 = vadd.f32 %v903_v37, %v884_v24  ;;  %v912_v46 = vadd.f32 %v904_v38, %v885_v25  ;;  %v913_v47 = vadd.f32 %v905_v39, %v886_v31  ;;  %v2896_v63 = vld [vmem:[%s2813_s8 + $0x90] sm:$0xff]  ;;  %v2901_v5 = vld [vmem:[%s2813_s8 + $0x98] sm:$0xff]  ;;  %v2904_v18 = vld [vmem:[%s2813_s8 + $0xa0] sm:$0xff] }
  0xb5   : >> { %v914_v52 = vadd.f32 %v906_v40, %v887_v32  ;;  %v918_v53 = vmul.f32 %v2370_v27, %v2849_v28  ;;  %v919_v54 = vmul.f32 %v2370_v27, %v2852_v29  ;;  %v920_v55 = vmul.f32 %v2370_v27, %v2855_v30  ;;  %v2907_v19 = vld [vmem:[%s2813_s8 + $0xa8] sm:$0xff]  ;;  %v2910_v23 = vld [vmem:[%s2813_s8 + $0xb0] sm:$0xff]  ;;  %v2916_v31 = vld [vmem:[%s2813_s8 + $0xb8] sm:$0xff] }
  0xb6   : >> { %v921_v57 = vmul.f32 %v2370_v27, %v2862_v35  ;;  %v922_v58 = vmul.f32 %v2370_v27, %v2871_v49  ;;  %v923_v59 = vmul.f32 %v2370_v27, %v2874_v50  ;;  %v924_v60 = vmul.f32 %v2370_v27, %v2877_v51  ;;  %v1608_v7 = vld [vmem:[%s830_s25] sm:$0x1] (%p847_p11) }
  0xb7   : >> { %v925_v0 = vmul.f32 %v2370_v27, %v2883_v56  ;;  %v926_v1 = vadd.f32 %v918_v53, %v907_v41  ;;  %v927_v2 = vadd.f32 %v919_v54, %v908_v42  ;;  %v928_v3 = vadd.f32 %v920_v55, %v909_v43 }
  0xb8   : >> { %v929_v6 = vadd.f32 %v921_v57, %v910_v44  ;;  %v930_v9 = vadd.f32 %v922_v58, %v911_v45  ;;  %v931_v10 = vadd.f32 %v923_v59, %v912_v46  ;;  %v932_v17 = vadd.f32 %v924_v60, %v913_v47 }
  0xb9   : >> { %v933_v24 = vadd.f32 %v925_v0, %v914_v52  ;;  %v937_v25 = vmul.f32 %v2371_v48, %v2871_v49  ;;  %v938_v26 = vmul.f32 %v2371_v48, %v2874_v50  ;;  %v939_v27 = vmul.f32 %v2371_v48, %v2877_v51 }
  0xba   : >> { %v940_v32 = vmul.f32 %v2371_v48, %v2883_v56  ;;  %v941_v33 = vmul.f32 %v2371_v48, %v2890_v61  ;;  %v942_v34 = vmul.f32 %v2371_v48, %v2893_v62  ;;  %v943_v36 = vmul.f32 %v2371_v48, %v2896_v63 }
  0xbb   : >> { %v944_v37 = vmul.f32 %v2371_v48, %v2901_v5  ;;  %v945_v38 = vadd.f32 %v937_v25, %v926_v1  ;;  %v946_v39 = vadd.f32 %v938_v26, %v927_v2  ;;  %v947_v40 = vadd.f32 %v939_v27, %v928_v3 }
  0xbc   : >> { %v948_v41 = vadd.f32 %v940_v32, %v929_v6  ;;  %v949_v42 = vadd.f32 %v941_v33, %v930_v9  ;;  %v950_v43 = vadd.f32 %v942_v34, %v931_v10  ;;  %v951_v44 = vadd.f32 %v943_v36, %v932_v17 }
  0xbd   : >> { %v952_v45 = vadd.f32 %v944_v37, %v933_v24  ;;  %v956_v46 = vmul.f32 %v2372_v4, %v2890_v61  ;;  %v957_v47 = vmul.f32 %v2372_v4, %v2893_v62  ;;  %v958_v52 = vmul.f32 %v2372_v4, %v2896_v63  ;;  %v2373_v37 = vld [vmem:[%s2798_s30 + $0x1] ss:$0 sm:$0xff] }
  0xbe   : >> { %v959_v53 = vmul.f32 %v2372_v4, %v2901_v5  ;;  %v960_v54 = vmul.f32 %v2372_v4, %v2904_v18  ;;  %v961_v48 = vmul.f32 %v2372_v4, %v2907_v19  ;;  %v962_v55 = vmul.f32 %v2372_v4, %v2910_v23 }
  0xbf   : >> { %v963_v57 = vmul.f32 %v2372_v4, %v2916_v31  ;;  %v2932_v58 = vadd.f32 %v956_v46, %v945_v38  ;;  %v2934_v59 = vadd.f32 %v957_v47, %v946_v39  ;;  %v2936_v60 = vadd.f32 %v958_v52, %v947_v40 }
  0xc0   : >> { %v2938_v0 = vadd.f32 %v959_v53, %v948_v41  ;;  %v2940_v1 = vadd.f32 %v960_v54, %v949_v42  ;;  %v2942_v2 = vadd.f32 %v961_v48, %v950_v43  ;;  %v2944_v3 = vadd.f32 %v962_v55, %v951_v44 }
  0xc1   : >> { %v2946_v6 = vadd.f32 %v963_v57, %v952_v45  ;;  %v973_v9 = vrot.slane %v2819_v12, 1  ;;  %v974_v4 = vrot.slane %v2822_v13, 1  ;;  %v975_v10 = vrot.slane %v2825_v14, 1 }
  0xc2   : >> { %v976_v17 = vrot.slane %v2828_v15, 1  ;;  %v977_v24 = vrot.slane %v2831_v16, 1  ;;  %v978_v25 = vrot.slane %v2838_v21, 1  ;;  %v979_v26 = vrot.slane %v2841_v22, 1 }
  0xc3   : >> { %v980_v27 = vrot.slane %v2849_v28, 1  ;;  %v981_v32 = vrot.slane %v2852_v29, 1  ;;  %v982_v33 = vrot.slane %v2855_v30, 1  ;;  %v983_v12 = vrot.slane %v2862_v35, 1 }
  0xc4   : >> { %v984_v13 = vrot.slane %v2871_v49, 1  ;;  %v985_v14 = vrot.slane %v2874_v50, 1  ;;  %v986_v15 = vrot.slane %v2877_v51, 1  ;;  %v987_v16 = vrot.slane %v2883_v56, 1 }
  0xc5   : >> { %v988_v21 = vrot.slane %v2890_v61, 1  ;;  %v989_v22 = vrot.slane %v2893_v62, 1  ;;  %v990_v28 = vrot.slane %v2896_v63, 1  ;;  %v991_v29 = vrot.slane %v2901_v5, 1 }
  0xc6   : >> { %v992_v30 = vrot.slane %v2904_v18, 1  ;;  %v993_v35 = vrot.slane %v2907_v19, 1  ;;  %v994_v49 = vrot.slane %v2910_v23, 1  ;;  %v995_v50 = vrot.slane %v2916_v31, 1 }
  0xc7   : >> { %v2973_v51 = vsel %vm996_vm1, %v990_v28, %v991_v29  ;;  %v2977_v56 = vsel %vm996_vm1, %v989_v22, %v990_v28  ;;  %v2981_v61 = vsel %vm996_vm1, %v988_v21, %v989_v22  ;;  %v2985_v62 = vsel %vm996_vm1, %v987_v16, %v988_v21 }
  0xc8   : >> { %v2989_v63 = vsel %vm996_vm1, %v994_v49, %v995_v50  ;;  %v2993_v5 = vsel %vm996_vm1, %v993_v35, %v994_v49  ;;  %v2997_v18 = vsel %vm996_vm1, %v992_v30, %v993_v35  ;;  %v3001_v19 = vsel %vm996_vm1, %v991_v29, %v992_v30 }
  0xc9   : >> { %v3005_v23 = vsel %vm996_vm1, %v986_v15, %v987_v16  ;;  %v3009_v31 = vsel %vm996_vm1, %v985_v14, %v986_v15  ;;  %v3013_v34 = vsel %vm996_vm1, %v984_v13, %v985_v14  ;;  %v3017_v36 = vsel %vm996_vm1, %v983_v12, %v984_v13  ;;  %v2375_v15 = vld [vmem:[%s2798_s30 + $0x11] ss:$0 sm:$0xff] }
  0xca   : >> { %v3022_v38 = vsel %vm996_vm1, %v982_v33, %v983_v12  ;;  %v3026_v39 = vsel %vm996_vm1, %v981_v32, %v982_v33  ;;  %v3030_v40 = vsel %vm996_vm1, %v980_v27, %v981_v32  ;;  %v3034_v41 = vsel %vm996_vm1, %v979_v26, %v980_v27 }
  0xcb   : >> { %v3038_v42 = vsel %vm996_vm1, %v978_v25, %v979_v26  ;;  %v3042_v43 = vsel %vm996_vm1, %v977_v24, %v978_v25  ;;  %v3046_v44 = vsel %vm996_vm1, %v976_v17, %v977_v24  ;;  %v3050_v45 = vsel %vm996_vm1, %v975_v10, %v976_v17 }
  0xcc   : >> { %v3054_v46 = vsel %vm996_vm1, %v974_v4, %v975_v10  ;;  %v3058_v47 = vsel %vm996_vm1, %v973_v9, %v974_v4  ;;  %v3064_v52 = vsel %vm996_vm1, %v972_v20, %v973_v9  ;;  %v3070_v53 = vsel %vm996_vm1, %v995_v50, %v972_v20  ;;  %v2374_v4 = vld [vmem:[%s2798_s30 + $0x9] ss:$0 sm:$0xff] }
  0xcd   : >> { %v1023_v54 = vmul.f32 %v2373_v37, %v3064_v52  ;;  %v1024_v48 = vmul.f32 %v2373_v37, %v3058_v47  ;;  %v1025_v55 = vmul.f32 %v2373_v37, %v3054_v46  ;;  %v1026_v57 = vmul.f32 %v2373_v37, %v3050_v45 }
  0xce   : >> { %v1027_v10 = vmul.f32 %v2373_v37, %v3046_v44  ;;  %v1028_v9 = vmul.f32 %v2373_v37, %v3042_v43  ;;  %v1029_v11 = vmul.f32 %v2373_v37, %v3038_v42  ;;  %v1030_v17 = vmul.f32 %v2373_v37, %v3034_v41 }
  0xcf   : >> { %v1031_v20 = vadd.f32 %v1023_v54, %v2932_v58  ;;  %v1032_v24 = vadd.f32 %v1024_v48, %v2934_v59  ;;  %v1033_v25 = vadd.f32 %v1025_v55, %v2936_v60  ;;  %v1034_v26 = vadd.f32 %v1026_v57, %v2938_v0  ;;  %v2376_v54 = vld [vmem:[%s2798_s30 + $0x19] ss:$0 sm:$0xff] }
  0xd0   : >> { %v1035_v27 = vadd.f32 %v1027_v10, %v2940_v1  ;;  %v1036_v32 = vadd.f32 %v1028_v9, %v2942_v2  ;;  %v1037_v33 = vadd.f32 %v1029_v11, %v2944_v3  ;;  %v1038_v12 = vadd.f32 %v1030_v17, %v2946_v6 }
  0xd1   : >> { %v1041_v13 = vmul.f32 %v2374_v4, %v3046_v44  ;;  %v1042_v14 = vmul.f32 %v2374_v4, %v3042_v43  ;;  %v1043_v58 = vmul.f32 %v2374_v4, %v3038_v42  ;;  %v1044_v59 = vmul.f32 %v2374_v4, %v3034_v41 }
  0xd2   : >> { %v1045_v60 = vmul.f32 %v2374_v4, %v3030_v40  ;;  %v1046_v0 = vmul.f32 %v2374_v4, %v3026_v39  ;;  %v1047_v1 = vmul.f32 %v2374_v4, %v3022_v38  ;;  %v1048_v2 = vmul.f32 %v2374_v4, %v3017_v36 }
  0xd3   : >> { %v1049_v3 = vadd.f32 %v1041_v13, %v1031_v20  ;;  %v1050_v6 = vadd.f32 %v1042_v14, %v1032_v24  ;;  %v1051_v16 = vadd.f32 %v1043_v58, %v1033_v25  ;;  %v1052_v21 = vadd.f32 %v1044_v59, %v1034_v26  ;;  %v2377_v13 = vld [vmem:[%s2798_s30 + $0x21] ss:$0 sm:$0xff] }
  0xd4   : >> { %v1053_v22 = vadd.f32 %v1045_v60, %v1035_v27  ;;  %v1054_v28 = vadd.f32 %v1046_v0, %v1036_v32  ;;  %v1055_v29 = vadd.f32 %v1047_v1, %v1037_v33  ;;  %v1056_v30 = vadd.f32 %v1048_v2, %v1038_v12 }
  0xd5   : >> { %v1059_v35 = vmul.f32 %v2375_v15, %v3030_v40  ;;  %v1060_v49 = vmul.f32 %v2375_v15, %v3026_v39  ;;  %v1061_v50 = vmul.f32 %v2375_v15, %v3022_v38  ;;  %v1062_v37 = vmul.f32 %v2375_v15, %v3017_v36 }
  0xd6   : >> { %v1063_v48 = vmul.f32 %v2375_v15, %v3013_v34  ;;  %v1064_v55 = vmul.f32 %v2375_v15, %v3009_v31  ;;  %v1065_v57 = vmul.f32 %v2375_v15, %v3005_v23  ;;  %v1066_v4 = vmul.f32 %v2375_v15, %v2985_v62 }
  0xd7   : >> { %v1067_v10 = vadd.f32 %v1059_v35, %v1049_v3  ;;  %v1068_v9 = vadd.f32 %v1060_v49, %v1050_v6  ;;  %v1069_v11 = vadd.f32 %v1061_v50, %v1051_v16  ;;  %v1070_v17 = vadd.f32 %v1062_v37, %v1052_v21 }
  0xd8   : >> { %v1071_v20 = vadd.f32 %v1063_v48, %v1053_v22  ;;  %v1072_v24 = vadd.f32 %v1064_v55, %v1054_v28  ;;  %v1073_v25 = vadd.f32 %v1065_v57, %v1055_v29  ;;  %v1074_v26 = vadd.f32 %v1066_v4, %v1056_v30 }
  0xd9   : >> { %v1077_v27 = vmul.f32 %v2376_v54, %v3013_v34  ;;  %v1078_v32 = vmul.f32 %v2376_v54, %v3009_v31  ;;  %v1079_v33 = vmul.f32 %v2376_v54, %v3005_v23  ;;  %v1080_v12 = vmul.f32 %v2376_v54, %v2985_v62 }
  0xda   : >> { %v1081_v14 = vmul.f32 %v2376_v54, %v2981_v61  ;;  %v1082_v58 = vmul.f32 %v2376_v54, %v2977_v56  ;;  %v1083_v59 = vmul.f32 %v2376_v54, %v2973_v51  ;;  %v1084_v15 = vmul.f32 %v2376_v54, %v3001_v19 }
  0xdb   : >> { %v1085_v60 = vadd.f32 %v1077_v27, %v1067_v10  ;;  %v1086_v0 = vadd.f32 %v1078_v32, %v1068_v9  ;;  %v1087_v1 = vadd.f32 %v1079_v33, %v1069_v11  ;;  %v1088_v2 = vadd.f32 %v1080_v12, %v1070_v17 }
  0xdc   : >> { %v1089_v3 = vadd.f32 %v1081_v14, %v1071_v20  ;;  %v1090_v6 = vadd.f32 %v1082_v58, %v1072_v24  ;;  %v1091_v16 = vadd.f32 %v1083_v59, %v1073_v25  ;;  %v1092_v21 = vadd.f32 %v1084_v15, %v1074_v26  ;;  %v2378_v59 = vld [vmem:[%s2798_s30 + $0x2] ss:$0 sm:$0xff] }
  0xdd   : >> { %v1095_v22 = vmul.f32 %v2377_v13, %v2981_v61  ;;  %v1096_v28 = vmul.f32 %v2377_v13, %v2977_v56  ;;  %v1097_v29 = vmul.f32 %v2377_v13, %v2973_v51  ;;  %v1098_v30 = vmul.f32 %v2377_v13, %v3001_v19 }
  0xde   : >> { %v1099_v35 = vmul.f32 %v2377_v13, %v2997_v18  ;;  %v1100_v49 = vmul.f32 %v2377_v13, %v2993_v5  ;;  %v1101_v50 = vmul.f32 %v2377_v13, %v2989_v63  ;;  %v1102_v37 = vmul.f32 %v2377_v13, %v3070_v53 }
  0xdf   : >> { %v3124_v54 = vadd.f32 %v1095_v22, %v1085_v60  ;;  %v3126_v48 = vadd.f32 %v1096_v28, %v1086_v0  ;;  %v3128_v55 = vadd.f32 %v1097_v29, %v1087_v1  ;;  %v3130_v57 = vadd.f32 %v1098_v30, %v1088_v2 }
  0xe0   : >> { %v3132_v4 = vadd.f32 %v1099_v35, %v1089_v3  ;;  %v3134_v10 = vadd.f32 %v1100_v49, %v1090_v6  ;;  %v3136_v9 = vadd.f32 %v1101_v50, %v1091_v16  ;;  %v3138_v11 = vadd.f32 %v1102_v37, %v1092_v21  ;;  %v2379_v37 = vld [vmem:[%s2798_s30 + $0xa] ss:$0 sm:$0xff] }
  0xe1   : >> { %v1111_v17 = vrot.slane %v3064_v52, 1  ;;  %v1112_v20 = vrot.slane %v3058_v47, 1  ;;  %v1113_v24 = vrot.slane %v3054_v46, 1  ;;  %v1114_v25 = vrot.slane %v3050_v45, 1 }
  0xe2   : >> { %v1115_v26 = vrot.slane %v3046_v44, 1  ;;  %v1116_v27 = vrot.slane %v3042_v43, 1  ;;  %v1117_v32 = vrot.slane %v3038_v42, 1  ;;  %v1118_v33 = vrot.slane %v3034_v41, 1 }
  0xe3   : >> { %v1119_v12 = vrot.slane %v3030_v40, 1  ;;  %v1120_v13 = vrot.slane %v3026_v39, 1  ;;  %v1121_v52 = vrot.slane %v3022_v38, 1  ;;  %v1122_v47 = vrot.slane %v3017_v36, 1 }
  0xe4   : >> { %v1123_v46 = vrot.slane %v3013_v34, 1  ;;  %v1124_v45 = vrot.slane %v3009_v31, 1  ;;  %v1125_v44 = vrot.slane %v3005_v23, 1  ;;  %v1126_v43 = vrot.slane %v2985_v62, 1 }
  0xe5   : >> { %v1127_v42 = vrot.slane %v2981_v61, 1  ;;  %v1128_v41 = vrot.slane %v2977_v56, 1  ;;  %v1129_v40 = vrot.slane %v2973_v51, 1  ;;  %v1130_v39 = vrot.slane %v3001_v19, 1 }
  0xe6   : >> { %v1131_v38 = vrot.slane %v2997_v18, 1  ;;  %v1132_v36 = vrot.slane %v2993_v5, 1  ;;  %v1133_v34 = vrot.slane %v2989_v63, 1  ;;  %v1134_v31 = vrot.slane %v3070_v53, 1 }
  0xe7   : >> { %v3166_v62 = vsel %vm996_vm1, %v1129_v40, %v1130_v39  ;;  %v3170_v56 = vsel %vm996_vm1, %v1128_v41, %v1129_v40  ;;  %v3174_v51 = vsel %vm996_vm1, %v1127_v42, %v1128_v41  ;;  %v3178_v61 = vsel %vm996_vm1, %v1126_v43, %v1127_v42 }
  0xe8   : >> { %v3182_v63 = vsel %vm996_vm1, %v1133_v34, %v1134_v31  ;;  %v3186_v5 = vsel %vm996_vm1, %v1132_v36, %v1133_v34  ;;  %v3190_v18 = vsel %vm996_vm1, %v1131_v38, %v1132_v36  ;;  %v3194_v19 = vsel %vm996_vm1, %v1130_v39, %v1131_v38 }
  0xe9   : >> { %v3198_v23 = vsel %vm996_vm1, %v1125_v44, %v1126_v43  ;;  %v3202_v53 = vsel %vm996_vm1, %v1124_v45, %v1125_v44  ;;  %v3206_v14 = vsel %vm996_vm1, %v1123_v46, %v1124_v45  ;;  %v3210_v58 = vsel %vm996_vm1, %v1122_v47, %v1123_v46  ;;  %v2380_v44 = vld [vmem:[%s2798_s30 + $0x12] ss:$0 sm:$0xff] }
  0xea   : >> { %v3215_v15 = vsel %vm996_vm1, %v1121_v52, %v1122_v47  ;;  %v3219_v60 = vsel %vm996_vm1, %v1120_v13, %v1121_v52  ;;  %v3223_v0 = vsel %vm996_vm1, %v1119_v12, %v1120_v13  ;;  %v3227_v1 = vsel %vm996_vm1, %v1118_v33, %v1119_v12 }
  0xeb   : >> { %v3231_v2 = vsel %vm996_vm1, %v1117_v32, %v1118_v33  ;;  %v3235_v3 = vsel %vm996_vm1, %v1116_v27, %v1117_v32  ;;  %v3239_v6 = vsel %vm996_vm1, %v1115_v26, %v1116_v27  ;;  %v3243_v16 = vsel %vm996_vm1, %v1114_v25, %v1115_v26 }
  0xec   : >> { %v3247_v21 = vsel %vm996_vm1, %v1113_v24, %v1114_v25  ;;  %v3251_v22 = vsel %vm996_vm1, %v1112_v20, %v1113_v24  ;;  %v3255_v28 = vsel %vm996_vm1, %v1111_v17, %v1112_v20  ;;  %v3259_v29 = vsel %vm996_vm1, %v1134_v31, %v1111_v17 }
  0xed   : >> { %v1161_v30 = vmul.f32 %v2378_v59, %v3255_v28  ;;  %v1162_v35 = vmul.f32 %v2378_v59, %v3251_v22  ;;  %v1163_v49 = vmul.f32 %v2378_v59, %v3247_v21  ;;  %v1164_v50 = vmul.f32 %v2378_v59, %v3243_v16 }
  0xee   : >> { %v1165_v24 = vmul.f32 %v2378_v59, %v3239_v6  ;;  %v1166_v25 = vmul.f32 %v2378_v59, %v3235_v3  ;;  %v1167_v20 = vmul.f32 %v2378_v59, %v3231_v2  ;;  %v1168_v26 = vmul.f32 %v2378_v59, %v3227_v1 }
  0xef   : >> { %v1169_v17 = vadd.f32 %v1161_v30, %v3124_v54  ;;  %v1170_v27 = vadd.f32 %v1162_v35, %v3126_v48  ;;  %v1171_v32 = vadd.f32 %v1163_v49, %v3128_v55  ;;  %v1172_v33 = vadd.f32 %v1164_v50, %v3130_v57  ;;  %v2381_v30 = vld [vmem:[%s2798_s30 + $0x1a] ss:$0 sm:$0xff] }
  0xf0   : >> { %v1173_v12 = vadd.f32 %v1165_v24, %v3132_v4  ;;  %v1174_v13 = vadd.f32 %v1166_v25, %v3134_v10  ;;  %v1175_v52 = vadd.f32 %v1167_v20, %v3136_v9  ;;  %v1176_v47 = vadd.f32 %v1168_v26, %v3138_v11 }
  0xf1   : >> { %v1179_v46 = vmul.f32 %v2379_v37, %v3239_v6  ;;  %v1180_v45 = vmul.f32 %v2379_v37, %v3235_v3  ;;  %v1181_v54 = vmul.f32 %v2379_v37, %v3231_v2  ;;  %v1182_v48 = vmul.f32 %v2379_v37, %v3227_v1 }
  0xf2   : >> { %v1183_v55 = vmul.f32 %v2379_v37, %v3223_v0  ;;  %v1184_v57 = vmul.f32 %v2379_v37, %v3219_v60  ;;  %v1185_v4 = vmul.f32 %v2379_v37, %v3215_v15  ;;  %v1186_v10 = vmul.f32 %v2379_v37, %v3210_v58 }
  0xf3   : >> { %v1187_v9 = vadd.f32 %v1179_v46, %v1169_v17  ;;  %v1188_v11 = vadd.f32 %v1180_v45, %v1170_v27  ;;  %v1189_v43 = vadd.f32 %v1181_v54, %v1171_v32  ;;  %v1190_v42 = vadd.f32 %v1182_v48, %v1172_v33  ;;  %v2382_v46 = vld [vmem:[%s2798_s30 + $0x22] ss:$0 sm:$0xff] }
  0xf4   : >> { %v1191_v41 = vadd.f32 %v1183_v55, %v1173_v12  ;;  %v1192_v40 = vadd.f32 %v1184_v57, %v1174_v13  ;;  %v1193_v39 = vadd.f32 %v1185_v4, %v1175_v52  ;;  %v1194_v38 = vadd.f32 %v1186_v10, %v1176_v47 }
  0xf5   : >> { %v1197_v36 = vmul.f32 %v2380_v44, %v3223_v0  ;;  %v1198_v34 = vmul.f32 %v2380_v44, %v3219_v60  ;;  %v1199_v31 = vmul.f32 %v2380_v44, %v3215_v15  ;;  %v1200_v59 = vmul.f32 %v2380_v44, %v3210_v58 }
  0xf6   : >> { %v1201_v35 = vmul.f32 %v2380_v44, %v3206_v14  ;;  %v1202_v49 = vmul.f32 %v2380_v44, %v3202_v53  ;;  %v1203_v50 = vmul.f32 %v2380_v44, %v3198_v23  ;;  %v1204_v37 = vmul.f32 %v2380_v44, %v3178_v61 }
  0xf7   : >> { %v1205_v24 = vadd.f32 %v1197_v36, %v1187_v9  ;;  %v1206_v25 = vadd.f32 %v1198_v34, %v1188_v11  ;;  %v1207_v20 = vadd.f32 %v1199_v31, %v1189_v43  ;;  %v1208_v26 = vadd.f32 %v1200_v59, %v1190_v42 }
  0xf8   : >> { %v1209_v17 = vadd.f32 %v1201_v35, %v1191_v41  ;;  %v1210_v27 = vadd.f32 %v1202_v49, %v1192_v40  ;;  %v1211_v32 = vadd.f32 %v1203_v50, %v1193_v39  ;;  %v1212_v33 = vadd.f32 %v1204_v37, %v1194_v38 }
  0xf9   : >> { %v1215_v12 = vmul.f32 %v2381_v30, %v3206_v14  ;;  %v1216_v13 = vmul.f32 %v2381_v30, %v3202_v53  ;;  %v1217_v52 = vmul.f32 %v2381_v30, %v3198_v23  ;;  %v1218_v47 = vmul.f32 %v2381_v30, %v3178_v61 }
  0xfa   : >> { %v1219_v45 = vmul.f32 %v2381_v30, %v3174_v51  ;;  %v1220_v54 = vmul.f32 %v2381_v30, %v3170_v56  ;;  %v1221_v48 = vmul.f32 %v2381_v30, %v3166_v62  ;;  %v1222_v44 = vmul.f32 %v2381_v30, %v3194_v19 }
  0xfb   : >> { %v1223_v55 = vadd.f32 %v1215_v12, %v1205_v24  ;;  %v1224_v57 = vadd.f32 %v1216_v13, %v1206_v25  ;;  %v1225_v4 = vadd.f32 %v1217_v52, %v1207_v20  ;;  %v1226_v10 = vadd.f32 %v1218_v47, %v1208_v26 }
  0xfc   : >> { %v1227_v9 = vadd.f32 %v1219_v45, %v1209_v17  ;;  %v1228_v11 = vadd.f32 %v1220_v54, %v1210_v27  ;;  %v1229_v43 = vadd.f32 %v1221_v48, %v1211_v32  ;;  %v1230_v42 = vadd.f32 %v1222_v44, %v1212_v33  ;;  %v2383_v48 = vld [vmem:[%s2798_s30 + $0x3] ss:$0 sm:$0xff] }
  0xfd   : >> { %v1233_v41 = vmul.f32 %v2382_v46, %v3174_v51  ;;  %v1234_v40 = vmul.f32 %v2382_v46, %v3170_v56  ;;  %v1235_v39 = vmul.f32 %v2382_v46, %v3166_v62  ;;  %v1236_v38 = vmul.f32 %v2382_v46, %v3194_v19 }
  0xfe   : >> { %v1237_v36 = vmul.f32 %v2382_v46, %v3190_v18  ;;  %v1238_v34 = vmul.f32 %v2382_v46, %v3186_v5  ;;  %v1239_v31 = vmul.f32 %v2382_v46, %v3182_v63  ;;  %v1240_v59 = vmul.f32 %v2382_v46, %v3259_v29 }
  0xff   : >> { %v3313_v30 = vadd.f32 %v1233_v41, %v1223_v55  ;;  %v3315_v35 = vadd.f32 %v1234_v40, %v1224_v57  ;;  %v3317_v49 = vadd.f32 %v1235_v39, %v1225_v4  ;;  %v3319_v50 = vadd.f32 %v1236_v38, %v1226_v10 }
 0x100   : >> { %v3321_v37 = vadd.f32 %v1237_v36, %v1227_v9  ;;  %v3323_v24 = vadd.f32 %v1238_v34, %v1228_v11  ;;  %v3325_v25 = vadd.f32 %v1239_v31, %v1229_v43  ;;  %v3327_v20 = vadd.f32 %v1240_v59, %v1230_v42  ;;  %v2384_v59 = vld [vmem:[%s2798_s30 + $0xb] ss:$0 sm:$0xff] }
 0x101   : >> { %v1249_v26 = vrot.slane %v3255_v28, 1  ;;  %v1250_v17 = vrot.slane %v3251_v22, 1  ;;  %v1251_v27 = vrot.slane %v3247_v21, 1  ;;  %v1252_v32 = vrot.slane %v3243_v16, 1 }
 0x102   : >> { %v1253_v33 = vrot.slane %v3239_v6, 1  ;;  %v1254_v12 = vrot.slane %v3235_v3, 1  ;;  %v1255_v13 = vrot.slane %v3231_v2, 1  ;;  %v1256_v52 = vrot.slane %v3227_v1, 1 }
 0x103   : >> { %v1257_v47 = vrot.slane %v3223_v0, 1  ;;  %v1258_v46 = vrot.slane %v3219_v60, 1  ;;  %v1259_v28 = vrot.slane %v3215_v15, 1  ;;  %v1260_v22 = vrot.slane %v3210_v58, 1 }
 0x104   : >> { %v1261_v21 = vrot.slane %v3206_v14, 1  ;;  %v1262_v16 = vrot.slane %v3202_v53, 1  ;;  %v1263_v6 = vrot.slane %v3198_v23, 1  ;;  %v1264_v3 = vrot.slane %v3178_v61, 1 }
 0x105   : >> { %v1265_v2 = vrot.slane %v3174_v51, 1  ;;  %v1266_v1 = vrot.slane %v3170_v56, 1  ;;  %v1267_v0 = vrot.slane %v3166_v62, 1  ;;  %v1268_v60 = vrot.slane %v3194_v19, 1 }
 0x106   : >> { %v1269_v15 = vrot.slane %v3190_v18, 1  ;;  %v1270_v58 = vrot.slane %v3186_v5, 1  ;;  %v1271_v14 = vrot.slane %v3182_v63, 1  ;;  %v1272_v53 = vrot.slane %v3259_v29, 1 }
 0x107   : >> { %v3355_v61 = vsel %vm996_vm1, %v1267_v0, %v1268_v60  ;;  %v3359_v56 = vsel %vm996_vm1, %v1266_v1, %v1267_v0  ;;  %v3363_v62 = vsel %vm996_vm1, %v1265_v2, %v1266_v1  ;;  %v3367_v51 = vsel %vm996_vm1, %v1264_v3, %v1265_v2 }
 0x108   : >> { %v3371_v63 = vsel %vm996_vm1, %v1271_v14, %v1272_v53  ;;  %v3375_v5 = vsel %vm996_vm1, %v1270_v58, %v1271_v14  ;;  %v3379_v18 = vsel %vm996_vm1, %v1269_v15, %v1270_v58  ;;  %v3383_v19 = vsel %vm996_vm1, %v1268_v60, %v1269_v15 }
 0x109   : >> { %v3387_v23 = vsel %vm996_vm1, %v1263_v6, %v1264_v3  ;;  %v3391_v29 = vsel %vm996_vm1, %v1262_v16, %v1263_v6  ;;  %v3395_v45 = vsel %vm996_vm1, %v1261_v21, %v1262_v16  ;;  %v3399_v54 = vsel %vm996_vm1, %v1260_v22, %v1261_v21  ;;  %v2385_v6 = vld [vmem:[%s2798_s30 + $0x13] ss:$0 sm:$0xff] }
 0x10a   : >> { %v3404_v44 = vsel %vm996_vm1, %v1259_v28, %v1260_v22  ;;  %v3408_v55 = vsel %vm996_vm1, %v1258_v46, %v1259_v28  ;;  %v3412_v57 = vsel %vm996_vm1, %v1257_v47, %v1258_v46  ;;  %v3416_v4 = vsel %vm996_vm1, %v1256_v52, %v1257_v47 }
 0x10b   : >> { %v3420_v10 = vsel %vm996_vm1, %v1255_v13, %v1256_v52  ;;  %v3424_v9 = vsel %vm996_vm1, %v1254_v12, %v1255_v13  ;;  %v3428_v11 = vsel %vm996_vm1, %v1253_v33, %v1254_v12  ;;  %v3432_v43 = vsel %vm996_vm1, %v1252_v32, %v1253_v33 }
 0x10c   : >> { %v3436_v42 = vsel %vm996_vm1, %v1251_v27, %v1252_v32  ;;  %v3440_v41 = vsel %vm996_vm1, %v1250_v17, %v1251_v27  ;;  %v3444_v40 = vsel %vm996_vm1, %v1249_v26, %v1250_v17  ;;  %v3448_v39 = vsel %vm996_vm1, %v1272_v53, %v1249_v26 }
 0x10d   : >> { %v1299_v38 = vmul.f32 %v2383_v48, %v3444_v40  ;;  %v1300_v36 = vmul.f32 %v2383_v48, %v3440_v41  ;;  %v1301_v34 = vmul.f32 %v2383_v48, %v3436_v42  ;;  %v1302_v31 = vmul.f32 %v2383_v48, %v3432_v43 }
 0x10e   : >> { %v1303_v27 = vmul.f32 %v2383_v48, %v3428_v11  ;;  %v1304_v32 = vmul.f32 %v2383_v48, %v3424_v9  ;;  %v1305_v17 = vmul.f32 %v2383_v48, %v3420_v10  ;;  %v1306_v33 = vmul.f32 %v2383_v48, %v3416_v4 }
 0x10f   : >> { %v1307_v26 = vadd.f32 %v1299_v38, %v3313_v30  ;;  %v1308_v12 = vadd.f32 %v1300_v36, %v3315_v35  ;;  %v1309_v13 = vadd.f32 %v1301_v34, %v3317_v49  ;;  %v1310_v52 = vadd.f32 %v1302_v31, %v3319_v50  ;;  %v2386_v38 = vld [vmem:[%s2798_s30 + $0x1b] ss:$0 sm:$0xff] }
 0x110   : >> { %v1311_v47 = vadd.f32 %v1303_v27, %v3321_v37  ;;  %v1312_v46 = vadd.f32 %v1304_v32, %v3323_v24  ;;  %v1313_v28 = vadd.f32 %v1305_v17, %v3325_v25  ;;  %v1314_v22 = vadd.f32 %v1306_v33, %v3327_v20 }
 0x111   : >> { %v1317_v21 = vmul.f32 %v2384_v59, %v3428_v11  ;;  %v1318_v16 = vmul.f32 %v2384_v59, %v3424_v9  ;;  %v1319_v30 = vmul.f32 %v2384_v59, %v3420_v10  ;;  %v1320_v35 = vmul.f32 %v2384_v59, %v3416_v4 }
 0x112   : >> { %v1321_v49 = vmul.f32 %v2384_v59, %v3412_v57  ;;  %v1322_v50 = vmul.f32 %v2384_v59, %v3408_v55  ;;  %v1323_v37 = vmul.f32 %v2384_v59, %v3404_v44  ;;  %v1324_v24 = vmul.f32 %v2384_v59, %v3399_v54 }
 0x113   : >> { %v1325_v25 = vadd.f32 %v1317_v21, %v1307_v26  ;;  %v1326_v20 = vadd.f32 %v1318_v16, %v1308_v12  ;;  %v1327_v3 = vadd.f32 %v1319_v30, %v1309_v13  ;;  %v1328_v2 = vadd.f32 %v1320_v35, %v1310_v52  ;;  %v2387_v21 = vld [vmem:[%s2798_s30 + $0x23] ss:$0 sm:$0xff] }
 0x114   : >> { %v1329_v1 = vadd.f32 %v1321_v49, %v1311_v47  ;;  %v1330_v0 = vadd.f32 %v1322_v50, %v1312_v46  ;;  %v1331_v60 = vadd.f32 %v1323_v37, %v1313_v28  ;;  %v1332_v15 = vadd.f32 %v1324_v24, %v1314_v22 }
 0x115   : >> { %v1335_v58 = vmul.f32 %v2385_v6, %v3412_v57  ;;  %v1336_v14 = vmul.f32 %v2385_v6, %v3408_v55  ;;  %v1337_v53 = vmul.f32 %v2385_v6, %v3404_v44  ;;  %v1338_v48 = vmul.f32 %v2385_v6, %v3399_v54 }
 0x116   : >> { %v1339_v36 = vmul.f32 %v2385_v6, %v3395_v45  ;;  %v1340_v34 = vmul.f32 %v2385_v6, %v3391_v29  ;;  %v1341_v31 = vmul.f32 %v2385_v6, %v3387_v23  ;;  %v1342_v59 = vmul.f32 %v2385_v6, %v3367_v51 }
 0x117   : >> { %v1343_v27 = vadd.f32 %v1335_v58, %v1325_v25  ;;  %v1344_v32 = vadd.f32 %v1336_v14, %v1326_v20  ;;  %v1345_v17 = vadd.f32 %v1337_v53, %v1327_v3  ;;  %v1346_v33 = vadd.f32 %v1338_v48, %v1328_v2 }
 0x118   : >> { %v1347_v26 = vadd.f32 %v1339_v36, %v1329_v1  ;;  %v1348_v12 = vadd.f32 %v1340_v34, %v1330_v0  ;;  %v1349_v13 = vadd.f32 %v1341_v31, %v1331_v60  ;;  %v1350_v52 = vadd.f32 %v1342_v59, %v1332_v15 }
 0x119   : >> { %v1353_v47 = vmul.f32 %v2386_v38, %v3395_v45  ;;  %v1354_v46 = vmul.f32 %v2386_v38, %v3391_v29  ;;  %v1355_v28 = vmul.f32 %v2386_v38, %v3387_v23  ;;  %v1356_v22 = vmul.f32 %v2386_v38, %v3367_v51 }
 0x11a   : >> { %v1357_v16 = vmul.f32 %v2386_v38, %v3363_v62  ;;  %v1358_v30 = vmul.f32 %v2386_v38, %v3359_v56  ;;  %v1359_v35 = vmul.f32 %v2386_v38, %v3355_v61  ;;  %v1360_v6 = vmul.f32 %v2386_v38, %v3383_v19 }
 0x11b   : >> { %v1361_v49 = vadd.f32 %v1353_v47, %v1343_v27  ;;  %v1362_v50 = vadd.f32 %v1354_v46, %v1344_v32  ;;  %v1363_v37 = vadd.f32 %v1355_v28, %v1345_v17  ;;  %v1364_v24 = vadd.f32 %v1356_v22, %v1346_v33 }
 0x11c   : >> { %v1365_v25 = vadd.f32 %v1357_v16, %v1347_v26  ;;  %v1366_v20 = vadd.f32 %v1358_v30, %v1348_v12  ;;  %v1367_v3 = vadd.f32 %v1359_v35, %v1349_v13  ;;  %v1368_v2 = vadd.f32 %v1360_v6, %v1350_v52 }
 0x11d   : >> { %v1371_v1 = vmul.f32 %v2387_v21, %v3363_v62  ;;  %v1372_v0 = vmul.f32 %v2387_v21, %v3359_v56  ;;  %v1373_v60 = vmul.f32 %v2387_v21, %v3355_v61  ;;  %v1374_v15 = vmul.f32 %v2387_v21, %v3383_v19 }
 0x11e   : >> { %v1375_v58 = vmul.f32 %v2387_v21, %v3379_v18  ;;  %v1376_v14 = vmul.f32 %v2387_v21, %v3375_v5  ;;  %v1377_v53 = vmul.f32 %v2387_v21, %v3371_v63  ;;  %v1378_v48 = vmul.f32 %v2387_v21, %v3448_v39 }
 0x11f   : >> { %v1379_v38 = vadd.f32 %v1371_v1, %v1361_v49  ;;  %v1380_v36 = vadd.f32 %v1372_v0, %v1362_v50  ;;  %v1381_v34 = vadd.f32 %v1373_v60, %v1363_v37  ;;  %v1382_v31 = vadd.f32 %v1374_v15, %v1364_v24  ;;  %v2389_v15 = vld [vmem:[%s2798_s30 + $0xc] ss:$0 sm:$0xff] }
 0x120   : >> { %v3502_v59 = vadd.f32 %v1375_v58, %v1365_v25  ;;  %v3504_v27 = vadd.f32 %v1376_v14, %v1366_v20  ;;  %v3506_v32 = vadd.f32 %v1377_v53, %v1367_v3  ;;  %v3508_v17 = vadd.f32 %v1378_v48, %v1368_v2 }
 0x121   : >> { %v1387_v33 = vrot.slane %v3444_v40, 1  ;;  %v1388_v26 = vrot.slane %v3440_v41, 1  ;;  %v1389_v12 = vrot.slane %v3436_v42, 1  ;;  %v1390_v13 = vrot.slane %v3432_v43, 1 }
 0x122   : >> { %v1391_v52 = vrot.slane %v3428_v11, 1  ;;  %v1392_v47 = vrot.slane %v3424_v9, 1  ;;  %v1393_v46 = vrot.slane %v3420_v10, 1  ;;  %v1398_v28 = vrot.slane %v3399_v54, 1 }
 0x123   : >> { %v1399_v22 = vrot.slane %v3395_v45, 1  ;;  %v1400_v21 = vrot.slane %v3391_v29, 1  ;;  %v1401_v40 = vrot.slane %v3387_v23, 1  ;;  %v1402_v41 = vrot.slane %v3367_v51, 1 }
 0x124   : >> { %v1403_v42 = vrot.slane %v3363_v62, 1  ;;  %v1404_v43 = vrot.slane %v3359_v56, 1  ;;  %v1405_v11 = vrot.slane %v3355_v61, 1  ;;  %v1406_v9 = vrot.slane %v3383_v19, 1 }
 0x125   : >> { %v1407_v10 = vrot.slane %v3379_v18, 1  ;;  %v1408_v54 = vrot.slane %v3375_v5, 1  ;;  %v1409_v45 = vrot.slane %v3371_v63, 1  ;;  %v1410_v29 = vrot.slane %v3448_v39, 1 }
 0x126   : >> { %v1394_v23 = vrot.slane %v3416_v4, 1  ;;  %v1395_v51 = vrot.slane %v3412_v57, 1  ;;  %v1396_v62 = vrot.slane %v3408_v55, 1  ;;  %v1397_v56 = vrot.slane %v3404_v44, 1  ;;  %v2388_v4 = vld [vmem:[%s2798_s30 + $0x4] ss:$0 sm:$0xff] }
 0x127   : >> { %v3536_v61 = vsel %vm996_vm1, %v1405_v11, %v1406_v9  ;;  %v3540_v18 = vsel %vm996_vm1, %v1404_v43, %v1405_v11  ;;  %v3544_v63 = vsel %vm996_vm1, %v1403_v42, %v1404_v43  ;;  %v3548_v5 = vsel %vm996_vm1, %v1402_v41, %v1403_v42 }
 0x128   : >> { %v3552_v19 = vsel %vm996_vm1, %v1409_v45, %v1410_v29  ;;  %v3556_v44 = vsel %vm996_vm1, %v1408_v54, %v1409_v45  ;;  %v3560_v55 = vsel %vm996_vm1, %v1407_v10, %v1408_v54  ;;  %v3564_v57 = vsel %vm996_vm1, %v1406_v9, %v1407_v10  ;;  %v2390_v9 = vld [vmem:[%s2798_s30 + $0x14] ss:$0 sm:$0xff] }
 0x129   : >> { %v3569_v39 = vsel %vm996_vm1, %v1401_v40, %v1402_v41  ;;  %v3573_v16 = vsel %vm996_vm1, %v1400_v21, %v1401_v40  ;;  %v1421_v30 = vsel %vm996_vm1, %v1399_v22, %v1400_v21  ;;  %v1422_v35 = vsel %vm996_vm1, %v1398_v28, %v1399_v22 }
 0x12a   : >> { %v1423_v6 = vsel %vm996_vm1, %v1397_v56, %v1398_v28  ;;  %v1424_v49 = vsel %vm996_vm1, %v1396_v62, %v1397_v56  ;;  %v1426_v50 = vsel %vm996_vm1, %v1394_v23, %v1395_v51  ;;  %v1430_v37 = vsel %vm996_vm1, %v1390_v13, %v1391_v52 }
 0x12b   : >> { %v1429_v24 = vsel %vm996_vm1, %v1391_v52, %v1392_v47  ;;  %v1431_v25 = vsel %vm996_vm1, %v1389_v12, %v1390_v13  ;;  %v1432_v20 = vsel %vm996_vm1, %v1388_v26, %v1389_v12  ;;  %v1433_v3 = vsel %vm996_vm1, %v1387_v33, %v1388_v26 }
 0x12c   : >> { %v1437_v2 = vmul.f32 %v2388_v4, %v1433_v3  ;;  %v1438_v1 = vmul.f32 %v2388_v4, %v1432_v20  ;;  %v1439_v0 = vmul.f32 %v2388_v4, %v1431_v25  ;;  %v1440_v60 = vmul.f32 %v2388_v4, %v1430_v37 }
 0x12d   : >> { %v1427_v58 = vsel %vm996_vm1, %v1393_v46, %v1394_v23  ;;  %v1428_v14 = vsel %vm996_vm1, %v1392_v47, %v1393_v46  ;;  %v1441_v53 = vmul.f32 %v2388_v4, %v1429_v24  ;;  %v1444_v48 = vmul.f32 %v2388_v4, %v1426_v50 }
 0x12e   : >> { %v1445_v13 = vadd.f32 %v1437_v2, %v1379_v38  ;;  %v1446_v52 = vadd.f32 %v1438_v1, %v1380_v36  ;;  %v1447_v12 = vadd.f32 %v1439_v0, %v1381_v34  ;;  %v1448_v28 = vadd.f32 %v1440_v60, %v1382_v31 }
 0x12f   : >> { %v1425_v26 = vsel %vm996_vm1, %v1395_v51, %v1396_v62  ;;  %v1434_v22 = vsel %vm996_vm1, %v1410_v29, %v1387_v33  ;;  %v1442_v21 = vmul.f32 %v2388_v4, %v1428_v14  ;;  %v1443_v40 = vmul.f32 %v2388_v4, %v1427_v58 }
 0x130   : >> { %v1455_v41 = vmul.f32 %v2389_v15, %v1429_v24  ;;  %v1456_v42 = vmul.f32 %v2389_v15, %v1428_v14  ;;  %v1457_v43 = vmul.f32 %v2389_v15, %v1427_v58  ;;  %v1458_v11 = vmul.f32 %v2389_v15, %v1426_v50 }
 0x131   : >> { %v1449_v47 = vadd.f32 %v1441_v53, %v3502_v59  ;;  %v1452_v38 = vadd.f32 %v1444_v48, %v3508_v17  ;;  %v1459_v36 = vmul.f32 %v2389_v15, %v1425_v26  ;;  %v1462_v34 = vmul.f32 %v2389_v15, %v1422_v35  ;;  %v2391_v59 = vld [vmem:[%s2798_s30 + $0x1c] ss:$0 sm:$0xff] }
 0x132   : >> { %v1463_v31 = vadd.f32 %v1455_v41, %v1445_v13  ;;  %v1464_v46 = vadd.f32 %v1456_v42, %v1446_v52  ;;  %v1465_v10 = vadd.f32 %v1457_v43, %v1447_v12  ;;  %v1466_v54 = vadd.f32 %v1458_v11, %v1448_v28 }
 0x133   : >> { %v1450_v33 = vadd.f32 %v1442_v21, %v3504_v27  ;;  %v1451_v45 = vadd.f32 %v1443_v40, %v3506_v32  ;;  %v1460_v29 = vmul.f32 %v2389_v15, %v1424_v49  ;;  %v1461_v23 = vmul.f32 %v2389_v15, %v1423_v6  ;;  %v2392_v15 = vld [vmem:[%s2798_s30 + $0x24] ss:$0 sm:$0xff] }
 0x134   : >> { %v1473_v51 = vmul.f32 %v2390_v9, %v1425_v26  ;;  %v1474_v62 = vmul.f32 %v2390_v9, %v1424_v49  ;;  %v1475_v56 = vmul.f32 %v2390_v9, %v1423_v6  ;;  %v1476_v4 = vmul.f32 %v2390_v9, %v1422_v35 }
 0x135   : >> { %v1467_v50 = vadd.f32 %v1459_v36, %v1449_v47  ;;  %v1470_v17 = vadd.f32 %v1462_v34, %v1452_v38  ;;  %v1477_v37 = vmul.f32 %v2390_v9, %v1421_v30  ;;  %v1480_v24 = vmul.f32 %v2390_v9, %v3548_v5 }
 0x136   : >> { %v1481_v25 = vadd.f32 %v1473_v51, %v1463_v31  ;;  %v1482_v20 = vadd.f32 %v1474_v62, %v1464_v46  ;;  %v1483_v3 = vadd.f32 %v1475_v56, %v1465_v10  ;;  %v1484_v2 = vadd.f32 %v1476_v4, %v1466_v54 }
 0x137   : >> { %v1468_v27 = vadd.f32 %v1460_v29, %v1450_v33  ;;  %v1469_v1 = vadd.f32 %v1461_v23, %v1451_v45  ;;  %v1478_v32 = vmul.f32 %v2390_v9, %v3573_v16  ;;  %v1479_v0 = vmul.f32 %v2390_v9, %v3569_v39 }
 0x138   : >> { %v1491_v49 = vmul.f32 %v2391_v59, %v1421_v30  ;;  %v1492_v35 = vmul.f32 %v2391_v59, %v3573_v16  ;;  %v1493_v6 = vmul.f32 %v2391_v59, %v3569_v39  ;;  %v1494_v60 = vmul.f32 %v2391_v59, %v3548_v5 }
 0x139   : >> { %v1485_v58 = vadd.f32 %v1477_v37, %v1467_v50  ;;  %v1488_v14 = vadd.f32 %v1480_v24, %v1470_v17  ;;  %v1495_v53 = vmul.f32 %v2391_v59, %v3544_v63  ;;  %v1498_v48 = vmul.f32 %v2391_v59, %v3564_v57 }
 0x13a   : >> { %v1499_v13 = vadd.f32 %v1491_v49, %v1481_v25  ;;  %v1500_v52 = vadd.f32 %v1492_v35, %v1482_v20  ;;  %v1501_v12 = vadd.f32 %v1493_v6, %v1483_v3  ;;  %v1502_v28 = vadd.f32 %v1494_v60, %v1484_v2 }
 0x13b   : >> { %v1486_v30 = vadd.f32 %v1478_v32, %v1468_v27  ;;  %v1487_v26 = vadd.f32 %v1479_v0, %v1469_v1  ;;  %v1496_v16 = vmul.f32 %v2391_v59, %v3540_v18  ;;  %v1497_v39 = vmul.f32 %v2391_v59, %v3536_v61 }
 0x13c   : >> { %v1509_v5 = vmul.f32 %v2392_v15, %v3544_v63  ;;  %v1510_v21 = vmul.f32 %v2392_v15, %v3540_v18  ;;  %v1511_v40 = vmul.f32 %v2392_v15, %v3536_v61  ;;  %v1512_v41 = vmul.f32 %v2392_v15, %v3564_v57 }
 0x13d   : >> { %v1503_v42 = vadd.f32 %v1495_v53, %v1485_v58  ;;  %v1506_v43 = vadd.f32 %v1498_v48, %v1488_v14  ;;  %v1513_v11 = vmul.f32 %v2392_v15, %v3560_v55  ;;  %v1516_v9 = vmul.f32 %v2392_v15, %v1434_v22  ;;  %v1550_v53 = vld [vmem:[#allocation2] sm:$0x1] }
 0x13e   : >> { %v1517_v47 = vadd.f32 %v1509_v5, %v1499_v13  ;;  %v1518_v38 = vadd.f32 %v1510_v21, %v1500_v52  ;;  %v1519_v63 = vadd.f32 %v1511_v40, %v1501_v12  ;;  %v1520_v36 = vadd.f32 %v1512_v41, %v1502_v28  ;;  %v1566_v28 = vld [vmem:[#allocation3] sm:$0x1] }
 0x13f   : >> { %v1504_v18 = vadd.f32 %v1496_v16, %v1486_v30  ;;  %v1505_v61 = vadd.f32 %v1497_v39, %v1487_v26  ;;  %v1514_v57 = vmul.f32 %v2392_v15, %v3556_v44  ;;  %v1515_v34 = vmul.f32 %v2392_v15, %v3552_v19 }
 0x140   : >> { %v1536_v55 = vsel %vm844_vm0, %v1520_v36, 0.0  ;;  %1542 = vst [vmem:[%s3629_s9] sm:$0xff] %v1517_v47  ;;  %v1551_v22 = vadd.f32 %v1518_v38, %v1517_v47  ;;  %v1567_v31 = vmul.f32 %v1517_v47, %v1517_v47  ;;  %v1568_v46 = vmul.f32 %v1518_v38, %v1518_v38 }
 0x141   : >> { %v1521_v10 = vadd.f32 %v1513_v11, %v1503_v42  ;;  %1543 = vst [vmem:[%s3629_s9 + $0x8] sm:$0xff] %v1518_v38  ;;  %v1569_v54 = vmul.f32 %v1519_v63, %v1519_v63  ;;  %v1524_v33 = vadd.f32 %v1516_v9, %v1506_v43  ;;  %v1522_v44 = vadd.f32 %v1514_v57, %v1504_v18 }
 0x142   : >> { %1544 = vst [vmem:[%s3629_s9 + $0x10] sm:$0xff] %v1519_v63  ;;  %v1552_v45 = vadd.f32 %v1551_v22, %v1519_v63  ;;  %v1570_v19 = vmul.f32 %v1536_v55, %v1536_v55  ;;  %v1575_v29 = vadd.f32 %v1568_v46, %v1567_v31  ;;  %v1523_v23 = vadd.f32 %v1515_v34, %v1505_v61  ;;  %v3660_v61 = vld [vmem:[%s833_s28] sm:$0x1] (%p847_p11) }
 0x143   : >> { %1545 = vst [vmem:[%s3629_s9 + $0x18] sm:$0xff] %v1536_v55  ;;  %v1571_v62 = vmul.f32 %v1521_v10, %v1521_v10  ;;  %v1540_v4 = vsel %vm844_vm0, %v1524_v33, 0.0  ;;  %v1572_v50 = vmul.f32 %v1522_v44, %v1522_v44 }
 0x144   : >> { %1546 = vst [vmem:[%s3629_s9 + $0x20] sm:$0xff] %v1521_v10  ;;  %v1553_v51 = vadd.f32 %v1552_v45, %v1536_v55  ;;  %v1576_v56 = vadd.f32 %v1575_v29, %v1569_v54  ;;  %v1573_v24 = vmul.f32 %v1523_v23, %v1523_v23  ;;  %v1574_v3 = vmul.f32 %v1540_v4, %v1540_v4 }
 0x145   : >> { %1547 = vst [vmem:[%s3629_s9 + $0x28] sm:$0xff] %v1522_v44 }
 0x146   : >> { %1548 = vst [vmem:[%s3629_s9 + $0x30] sm:$0xff] %v1523_v23  ;;  %v1554_v59 = vadd.f32 %v1553_v51, %v1521_v10  ;;  %v1577_v17 = vadd.f32 %v1576_v56, %v1570_v19 }
 0x147   : >> { %1549 = vst [vmem:[%s3629_s9 + $0x38] sm:$0xff] %v1540_v4 }
 0x148   : >> { %v1555_v37 = vadd.f32 %v1554_v59, %v1522_v44  ;;  %v1578_v25 = vadd.f32 %v1577_v17, %v1571_v62 }
 0x14a   : >> { %v1556_v20 = vadd.f32 %v1555_v37, %v1523_v23  ;;  %v1579_v2 = vadd.f32 %v1578_v25, %v1572_v50 }
 0x14c   : >> { %v1557_v27 = vadd.f32 %v1556_v20, %v1540_v4  ;;  %v1580_v1 = vadd.f32 %v1579_v2, %v1573_v24 }
 0x14e   : >> { %v1558_v32 = vrot.slane %v1557_v27, 4  ;;  %v1581_v0 = vadd.f32 %v1580_v1, %v1574_v3 }
 0x150   : >> { %v1559_v49 = vadd.f32 %v1558_v32, %v1557_v27  ;;  %v1582_v35 = vrot.slane %v1581_v0, 4 }
 0x152   : >> { %v1560_v6 = vrot.slane %v1559_v49, 2  ;;  %v1583_v60 = vadd.f32 %v1582_v35, %v1581_v0 }
 0x154   : >> { %v1561_v15 = vadd.f32 %v1560_v6, %v1559_v49  ;;  %v1584_v58 = vrot.slane %v1583_v60, 2 }
 0x156   : >> { %v1562_v14 = vrot.slane %v1561_v15, 1  ;;  %v1585_v48 = vadd.f32 %v1584_v58, %v1583_v60 }
 0x158   : >> { %v1563_v13 = vadd.f32 %v1562_v14, %v1561_v15  ;;  %v1586_v52 = vrot.slane %v1585_v48, 1 }
 0x15a   : >> { %v1564_v12 = vadd.f32 %v1563_v13, %v1550_v53  ;;  %v1587_v30 = vadd.f32 %v1586_v52, %v1585_v48  ;;  %849 = sbr.rel (!%p847_p11) target bundleno = 172 (0xac), region = 220 }
 0x15c   : >> { %1565 = vst [vmem:[#allocation2] sm:$0x1] %v1564_v12  ;;  %v1588_v26 = vadd.f32 %v1587_v30, %v1566_v28 }
 0x15e   : >> { %1589 = vst [vmem:[#allocation3] sm:$0x1] %v1588_v26 }
 0x163   : > { %v1590_v16 = vld [vmem:[#allocation2] sm:$0x1] }
 0x164   : > { %v1591_v5 = vmul.f32 0.0012755102, %v1590_v16 }
 0x165   : > { %v1592_v39 = vld [vmem:[#allocation3] sm:$0x1] }
 0x166   : > { %v1593_v21 = vmul.f32 0.0012755102, %v1592_v39  ;;  %v1594_v40 = vmul.f32 %v1591_v5, %v1591_v5 }
 0x168   : > { %v1595_v41 = vsub.f32 %v1593_v21, %v1594_v40 }
 0x16a   : > { %v1596_v42 = vmax.f32 %v1595_v41, 0.0 }
 0x16c   : > { %v1597_v43 = vadd.f32 0.001, %v1596_v42 }
 0x16e   : > { %2393 = vrsqrt.f32 %v1597_v43  ;;  %vm1604_vm2 = vweird.f32 %v1597_v43 }
 0x174   : > { %v2394_v11 = vpop.eup %2393 }
 0x175   : > { %v1599_v9 = vmul.f32 %v2394_v11, %v1597_v43  ;;  %vm1605_vm3 = vweird.f32 %v2394_v11 }
 0x176   : > { %vm1606_vm4 = vmor %vm1604_vm2, %vm1605_vm3 }
 0x177   : > { %v1600_v47 = vmul.f32 %v2394_v11, %v1599_v9 }
 0x179   : > { %v1601_v38 = vmul.f32 0.5, %v1600_v47 }
 0x17b   : > { %v1602_v63 = vsub.f32 1.5, %v1601_v38 }
 0x17d   : > { %v1603_v36 = vmul.f32 %v2394_v11, %v1602_v63 }
 0x17f   : > { %v1607_v8 = vsel %vm1606_vm4, %v2394_v11, %v1603_v36 }
 0x180   : > { %v3653_v18 = vmul.f32 %v1608_v7, %v1607_v8 }
 0x182   : > { %v3663_v57 = vmul.f32 %v3653_v18, %v1591_v5 }
 0x184   : > { %v1612_v34 = vsub.f32 %v3660_v61, %v3663_v57 }
 0x185 LB: >> { %v1639_v55 = vperm.slane %v3653_v18, 0  ;;  %s2323_s20 = sshll.u32 %s2433_s14, 7  ;;  %s1618_s14 = sadd.s32 1, %s2433_s14   ;;  %s2433_s14 = sphi %s3667_s14, %s1618_s14  }
 0x186   : >> { %s3675_s21 = scalar_lea.vmem %s2800_s5, %s2323_s20 [#allocation6]  ;;  %v1658_v22 = vperm.slane %v1612_v34, 0  ;;  %p1615_p12 = scmp.ge.s32.totalorder %s1618_s14, 7  }
 0x187   : >> { %v1622_v31 = vld [vmem:[%s3675_s21] sm:$0xff]  ;;  %v1623_v46 = vld [vmem:[%s3675_s21 + $0x8] sm:$0xff]  ;;  %v1624_v10 = vld [vmem:[%s3675_s21 + $0x10] sm:$0xff] }
 0x188   : >> { %v1641_v54 = vmul.f32 %v1639_v55, %v1622_v31  ;;  %v1642_v33 = vmul.f32 %v1639_v55, %v1623_v46  ;;  %v1643_v45 = vmul.f32 %v1639_v55, %v1624_v10  ;;  %v1625_v44 = vld [vmem:[%s3675_s21 + $0x18] sm:$0xff]  ;;  %v1626_v19 = vld [vmem:[%s3675_s21 + $0x20] sm:$0xff]  ;;  %v1627_v29 = vld [vmem:[%s3675_s21 + $0x28] sm:$0xff] }
 0x189   : >> { %v1644_v23 = vmul.f32 %v1639_v55, %v1625_v44  ;;  %v1645_v51 = vmul.f32 %v1639_v55, %v1626_v19  ;;  %v1646_v62 = vmul.f32 %v1639_v55, %v1627_v29  ;;  %v1628_v56 = vld [vmem:[%s3675_s21 + $0x30] sm:$0xff]  ;;  %v1629_v4 = vld [vmem:[%s3675_s21 + $0x38] sm:$0xff]  ;;  %v1630_v59 = vld [vmem:[%s3675_s21 + $0x40] sm:$0xff] }
 0x18a   : >> { %v1660_v50 = vadd.f32 %v1658_v22, %v1641_v54  ;;  %v1661_v17 = vadd.f32 %v1658_v22, %v1642_v33  ;;  %v1662_v37 = vadd.f32 %v1658_v22, %v1643_v45  ;;  %v1647_v24 = vmul.f32 %v1639_v55, %v1628_v56  ;;  %v1631_v25 = vld [vmem:[%s3675_s21 + $0x48] sm:$0xff]  ;;  %v1632_v2 = vld [vmem:[%s3675_s21 + $0x50] sm:$0xff]  ;;  %v1633_v32 = vld [vmem:[%s3675_s21 + $0x58] sm:$0xff] }
 0x18b   : >> { %v1663_v20 = vadd.f32 %v1658_v22, %v1644_v23  ;;  %v1648_v3 = vmul.f32 %v1639_v55, %v1629_v4  ;;  %v1664_v27 = vadd.f32 %v1658_v22, %v1645_v51  ;;  %v1649_v1 = vmul.f32 %v1639_v55, %v1630_v59  ;;  %v1634_v35 = vld [vmem:[%s3675_s21 + $0x60] sm:$0xff]  ;;  %v1635_v15 = vld [vmem:[%s3675_s21 + $0x68] sm:$0xff]  ;;  %v1636_v53 = vld [vmem:[%s3675_s21 + $0x70] sm:$0xff] }
 0x18c   : >> { %1676 = vst [vmem:[%s3675_s21] sm:$0xff] %v1660_v50  ;;  %v1665_v0 = vadd.f32 %v1658_v22, %v1646_v62  ;;  %v1650_v49 = vmul.f32 %v1639_v55, %v1631_v25  ;;  %v1666_v6 = vadd.f32 %v1658_v22, %v1647_v24  ;;  %v1651_v60 = vmul.f32 %v1639_v55, %v1632_v2  ;;  %v1637_v52 = vld [vmem:[%s3675_s21 + $0x78] sm:$0xff] }
 0x18d   : >> { %1677 = vst [vmem:[%s3675_s21 + $0x8] sm:$0xff] %v1661_v17  ;;  %v1667_v58 = vadd.f32 %v1658_v22, %v1648_v3  ;;  %v1652_v14 = vmul.f32 %v1639_v55, %v1633_v32  ;;  %v1668_v48 = vadd.f32 %v1658_v22, %v1649_v1  ;;  %v1653_v13 = vmul.f32 %v1639_v55, %v1634_v35 }
 0x18e   : >> { %1678 = vst [vmem:[%s3675_s21 + $0x10] sm:$0xff] %v1662_v37  ;;  %v1669_v12 = vadd.f32 %v1658_v22, %v1650_v49  ;;  %v1654_v28 = vmul.f32 %v1639_v55, %v1635_v15  ;;  %v1670_v30 = vadd.f32 %v1658_v22, %v1651_v60  ;;  %v1655_v26 = vmul.f32 %v1639_v55, %v1636_v53 }
 0x18f   : >> { %1679 = vst [vmem:[%s3675_s21 + $0x18] sm:$0xff] %v1663_v20  ;;  %v1671_v16 = vadd.f32 %v1658_v22, %v1652_v14  ;;  %v1656_v39 = vmul.f32 %v1639_v55, %v1637_v52  ;;  %v1672_v5 = vadd.f32 %v1658_v22, %v1653_v13 }
 0x190   : >> { %1680 = vst [vmem:[%s3675_s21 + $0x20] sm:$0xff] %v1664_v27  ;;  %v1673_v21 = vadd.f32 %v1658_v22, %v1654_v28  ;;  %v1674_v40 = vadd.f32 %v1658_v22, %v1655_v26 }
 0x191   : >> { %1681 = vst [vmem:[%s3675_s21 + $0x28] sm:$0xff] %v1665_v0  ;;  %v1675_v41 = vadd.f32 %v1658_v22, %v1656_v39 }
 0x192   : >> { %1682 = vst [vmem:[%s3675_s21 + $0x30] sm:$0xff] %v1666_v6 }
 0x193   : >> { %1683 = vst [vmem:[%s3675_s21 + $0x38] sm:$0xff] %v1667_v58 }
 0x194   : >> { %1684 = vst [vmem:[%s3675_s21 + $0x40] sm:$0xff] %v1668_v48 }
 0x195   : >> { %1685 = vst [vmem:[%s3675_s21 + $0x48] sm:$0xff] %v1669_v12 }
 0x196   : >> { %1686 = vst [vmem:[%s3675_s21 + $0x50] sm:$0xff] %v1670_v30 }
 0x197   : >> { %1687 = vst [vmem:[%s3675_s21 + $0x58] sm:$0xff] %v1671_v16  ;;  %1617 = sbr.rel (!%p1615_p12) target bundleno = 389 (0x185), region = 231 }
 0x198   : >> { %1688 = vst [vmem:[%s3675_s21 + $0x60] sm:$0xff] %v1672_v5 }
 0x199   : >> { %1689 = vst [vmem:[%s3675_s21 + $0x68] sm:$0xff] %v1673_v21 }
 0x19a   : >> { %1690 = vst [vmem:[%s3675_s21 + $0x70] sm:$0xff] %v1674_v40 }
 0x19b   : >> { %1691 = vst [vmem:[%s3675_s21 + $0x78] sm:$0xff] %v1675_v41 }
 0x19c   : > { %1698 = sbr.rel (!%p2496_p5) target bundleno = 531 (0x213), region = 130  ;;  %s2319_s17 = sshll.u32 (%p2496_p5), %s2477_s18, 3 }
 0x19d   : > { %s3723_s25 = scalar_lea.vmem (%p2496_p5), %s3961_s4, %s2319_s17 }
 0x1a2   : > { %v1951_v42 = vld [vmem:[%s2800_s5] sm:$0xff]  ;;  %v1953_v43 = vld [vmem:[%s2800_s5 + $0x8] sm:$0xff]  ;;  %v1955_v11 = vld [vmem:[%s2800_s5 + $0x10] sm:$0xff] }
 0x1a3   : > { %1952 = vst [vmem:[%s3723_s25] sm:$0xff] %v1951_v42  ;;  %v1957_v9 = vld [vmem:[%s2800_s5 + $0x18] sm:$0xff]  ;;  %v1959_v47 = vld [vmem:[%s2800_s5 + $0x20] sm:$0xff]  ;;  %v1961_v38 = vld [vmem:[%s2800_s5 + $0x28] sm:$0xff] }
 0x1a4   : > { %1954 = vst [vmem:[%s3723_s25 + $0x20] sm:$0xff] %v1953_v43  ;;  %v1963_v63 = vld [vmem:[%s2800_s5 + $0x30] sm:$0xff]  ;;  %v1965_v36 = vld [vmem:[%s2800_s5 + $0x38] sm:$0xff]  ;;  %v1967_v7 = vld [vmem:[%s2800_s5 + $0x40] sm:$0xff] }
 0x1a5   : > { %1956 = vst [vmem:[%s3723_s25 + $0x40] sm:$0xff] %v1955_v11  ;;  %v1969_v8 = vld [vmem:[%s2800_s5 + $0x48] sm:$0xff]  ;;  %v1971_v18 = vld [vmem:[%s2800_s5 + $0x50] sm:$0xff]  ;;  %v1973_v61 = vld [vmem:[%s2800_s5 + $0x58] sm:$0xff] }
 0x1a6   : > { %1958 = vst [vmem:[%s3723_s25 + $0x60] sm:$0xff] %v1957_v9  ;;  %v1975_v57 = vld [vmem:[%s2800_s5 + $0x60] sm:$0xff]  ;;  %v1977_v34 = vld [vmem:[%s2800_s5 + $0x68] sm:$0xff]  ;;  %v1979_v55 = vld [vmem:[%s2800_s5 + $0x70] sm:$0xff] }
 0x1a7   : > { %1960 = vst [vmem:[%s3723_s25 + $0x80] sm:$0xff] %v1959_v47  ;;  %v1981_v22 = vld [vmem:[%s2800_s5 + $0x78] sm:$0xff]  ;;  %v1983_v31 = vld [vmem:[%s2800_s5 + $0x80] sm:$0xff]  ;;  %v1985_v46 = vld [vmem:[%s2800_s5 + $0x88] sm:$0xff] }
 0x1a8   : > { %1962 = vst [vmem:[%s3723_s25 + $0xa0] sm:$0xff] %v1961_v38  ;;  %v1987_v10 = vld [vmem:[%s2800_s5 + $0x90] sm:$0xff]  ;;  %v1989_v54 = vld [vmem:[%s2800_s5 + $0x98] sm:$0xff]  ;;  %v1991_v33 = vld [vmem:[%s2800_s5 + $0xa0] sm:$0xff] }
 0x1a9   : > { %1964 = vst [vmem:[%s3723_s25 + $0xc0] sm:$0xff] %v1963_v63  ;;  %v1993_v45 = vld [vmem:[%s2800_s5 + $0xa8] sm:$0xff]  ;;  %v1995_v44 = vld [vmem:[%s2800_s5 + $0xb0] sm:$0xff]  ;;  %v1997_v19 = vld [vmem:[%s2800_s5 + $0xb8] sm:$0xff] }
 0x1aa   : > { %1966 = vst [vmem:[%s3723_s25 + $0xe0] sm:$0xff] %v1965_v36  ;;  %v1999_v29 = vld [vmem:[%s2800_s5 + $0xc0] sm:$0xff]  ;;  %v2001_v23 = vld [vmem:[%s2800_s5 + $0xc8] sm:$0xff]  ;;  %v2003_v51 = vld [vmem:[%s2800_s5 + $0xd0] sm:$0xff] }
 0x1ab   : > { %1968 = vst [vmem:[%s3723_s25 + $0x100] sm:$0xff] %v1967_v7  ;;  %v2005_v62 = vld [vmem:[%s2800_s5 + $0xd8] sm:$0xff]  ;;  %v2007_v56 = vld [vmem:[%s2800_s5 + $0xe0] sm:$0xff]  ;;  %v2009_v4 = vld [vmem:[%s2800_s5 + $0xe8] sm:$0xff] }
 0x1ac   : > { %1970 = vst [vmem:[%s3723_s25 + $0x120] sm:$0xff] %v1969_v8  ;;  %v2011_v59 = vld [vmem:[%s2800_s5 + $0xf0] sm:$0xff]  ;;  %v2013_v50 = vld [vmem:[%s2800_s5 + $0xf8] sm:$0xff]  ;;  %v2015_v17 = vld [vmem:[%s2800_s5 + $0x100] sm:$0xff] }
 0x1ad   : > { %1972 = vst [vmem:[%s3723_s25 + $0x140] sm:$0xff] %v1971_v18  ;;  %v2017_v37 = vld [vmem:[%s2800_s5 + $0x108] sm:$0xff]  ;;  %v2019_v24 = vld [vmem:[%s2800_s5 + $0x110] sm:$0xff]  ;;  %v2021_v25 = vld [vmem:[%s2800_s5 + $0x118] sm:$0xff] }
 0x1ae   : > { %1974 = vst [vmem:[%s3723_s25 + $0x160] sm:$0xff] %v1973_v61  ;;  %v2023_v20 = vld [vmem:[%s2800_s5 + $0x120] sm:$0xff]  ;;  %v2025_v3 = vld [vmem:[%s2800_s5 + $0x128] sm:$0xff]  ;;  %v2027_v2 = vld [vmem:[%s2800_s5 + $0x130] sm:$0xff] }
 0x1af   : > { %1976 = vst [vmem:[%s3723_s25 + $0x180] sm:$0xff] %v1975_v57  ;;  %v2029_v27 = vld [vmem:[%s2800_s5 + $0x138] sm:$0xff]  ;;  %v2031_v1 = vld [vmem:[%s2800_s5 + $0x140] sm:$0xff]  ;;  %v2033_v32 = vld [vmem:[%s2800_s5 + $0x148] sm:$0xff] }
 0x1b0   : > { %1978 = vst [vmem:[%s3723_s25 + $0x1a0] sm:$0xff] %v1977_v34  ;;  %v2035_v0 = vld [vmem:[%s2800_s5 + $0x150] sm:$0xff]  ;;  %v2037_v49 = vld [vmem:[%s2800_s5 + $0x158] sm:$0xff]  ;;  %v2039_v35 = vld [vmem:[%s2800_s5 + $0x160] sm:$0xff] }
 0x1b1   : > { %1980 = vst [vmem:[%s3723_s25 + $0x1c0] sm:$0xff] %v1979_v55  ;;  %v2041_v6 = vld [vmem:[%s2800_s5 + $0x168] sm:$0xff]  ;;  %v2043_v60 = vld [vmem:[%s2800_s5 + $0x170] sm:$0xff]  ;;  %v2045_v15 = vld [vmem:[%s2800_s5 + $0x178] sm:$0xff] }
 0x1b2   : > { %1982 = vst [vmem:[%s3723_s25 + $0x1e0] sm:$0xff] %v1981_v22  ;;  %v2047_v58 = vld [vmem:[%s2800_s5 + $0x180] sm:$0xff]  ;;  %v2049_v14 = vld [vmem:[%s2800_s5 + $0x188] sm:$0xff]  ;;  %v2051_v53 = vld [vmem:[%s2800_s5 + $0x190] sm:$0xff] }
 0x1b3   : > { %1984 = vst [vmem:[%s3723_s25 + $0x200] sm:$0xff] %v1983_v31  ;;  %v2053_v48 = vld [vmem:[%s2800_s5 + $0x198] sm:$0xff]  ;;  %v2055_v13 = vld [vmem:[%s2800_s5 + $0x1a0] sm:$0xff]  ;;  %v2057_v52 = vld [vmem:[%s2800_s5 + $0x1a8] sm:$0xff] }
 0x1b4   : > { %1986 = vst [vmem:[%s3723_s25 + $0x220] sm:$0xff] %v1985_v46  ;;  %v2059_v12 = vld [vmem:[%s2800_s5 + $0x1b0] sm:$0xff]  ;;  %v2061_v28 = vld [vmem:[%s2800_s5 + $0x1b8] sm:$0xff]  ;;  %v2063_v30 = vld [vmem:[%s2800_s5 + $0x1c0] sm:$0xff] }
 0x1b5   : > { %1988 = vst [vmem:[%s3723_s25 + $0x240] sm:$0xff] %v1987_v10  ;;  %v2065_v26 = vld [vmem:[%s2800_s5 + $0x1c8] sm:$0xff]  ;;  %v2067_v16 = vld [vmem:[%s2800_s5 + $0x1d0] sm:$0xff]  ;;  %v2069_v39 = vld [vmem:[%s2800_s5 + $0x1d8] sm:$0xff] }
 0x1b6   : > { %1990 = vst [vmem:[%s3723_s25 + $0x260] sm:$0xff] %v1989_v54  ;;  %v2071_v5 = vld [vmem:[%s2800_s5 + $0x1e0] sm:$0xff]  ;;  %v2073_v21 = vld [vmem:[%s2800_s5 + $0x1e8] sm:$0xff]  ;;  %v2075_v40 = vld [vmem:[%s2800_s5 + $0x1f0] sm:$0xff] }
 0x1b7   : > { %1992 = vst [vmem:[%s3723_s25 + $0x280] sm:$0xff] %v1991_v33  ;;  %v2077_v41 = vld [vmem:[%s2800_s5 + $0x1f8] sm:$0xff]  ;;  %v2079_v42 = vld [vmem:[%s2800_s5 + $0x200] sm:$0xff]  ;;  %v2081_v43 = vld [vmem:[%s2800_s5 + $0x208] sm:$0xff] }
 0x1b8   : > { %1994 = vst [vmem:[%s3723_s25 + $0x2a0] sm:$0xff] %v1993_v45  ;;  %v2083_v11 = vld [vmem:[%s2800_s5 + $0x210] sm:$0xff]  ;;  %v2085_v9 = vld [vmem:[%s2800_s5 + $0x218] sm:$0xff]  ;;  %v2087_v47 = vld [vmem:[%s2800_s5 + $0x220] sm:$0xff] }
 0x1b9   : > { %1996 = vst [vmem:[%s3723_s25 + $0x2c0] sm:$0xff] %v1995_v44  ;;  %v2089_v38 = vld [vmem:[%s2800_s5 + $0x228] sm:$0xff]  ;;  %v2091_v63 = vld [vmem:[%s2800_s5 + $0x230] sm:$0xff]  ;;  %v2093_v36 = vld [vmem:[%s2800_s5 + $0x238] sm:$0xff] }
 0x1ba   : > { %1998 = vst [vmem:[%s3723_s25 + $0x2e0] sm:$0xff] %v1997_v19  ;;  %v2095_v7 = vld [vmem:[%s2800_s5 + $0x240] sm:$0xff]  ;;  %v2097_v8 = vld [vmem:[%s2800_s5 + $0x248] sm:$0xff]  ;;  %v2099_v18 = vld [vmem:[%s2800_s5 + $0x250] sm:$0xff] }
 0x1bb   : > { %2000 = vst [vmem:[%s3723_s25 + $0x300] sm:$0xff] %v1999_v29  ;;  %v2101_v61 = vld [vmem:[%s2800_s5 + $0x258] sm:$0xff]  ;;  %v2103_v57 = vld [vmem:[%s2800_s5 + $0x260] sm:$0xff]  ;;  %v2105_v34 = vld [vmem:[%s2800_s5 + $0x268] sm:$0xff] }
 0x1bc   : > { %2002 = vst [vmem:[%s3723_s25 + $0x320] sm:$0xff] %v2001_v23  ;;  %v2107_v55 = vld [vmem:[%s2800_s5 + $0x270] sm:$0xff]  ;;  %v2109_v22 = vld [vmem:[%s2800_s5 + $0x278] sm:$0xff]  ;;  %v2111_v31 = vld [vmem:[%s2800_s5 + $0x280] sm:$0xff] }
 0x1bd   : > { %2004 = vst [vmem:[%s3723_s25 + $0x340] sm:$0xff] %v2003_v51  ;;  %v2113_v46 = vld [vmem:[%s2800_s5 + $0x288] sm:$0xff]  ;;  %v2115_v10 = vld [vmem:[%s2800_s5 + $0x290] sm:$0xff]  ;;  %v2117_v54 = vld [vmem:[%s2800_s5 + $0x298] sm:$0xff] }
 0x1be   : > { %2006 = vst [vmem:[%s3723_s25 + $0x360] sm:$0xff] %v2005_v62  ;;  %v2119_v33 = vld [vmem:[%s2800_s5 + $0x2a0] sm:$0xff]  ;;  %v2121_v45 = vld [vmem:[%s2800_s5 + $0x2a8] sm:$0xff]  ;;  %v2123_v44 = vld [vmem:[%s2800_s5 + $0x2b0] sm:$0xff] }
 0x1bf   : > { %2008 = vst [vmem:[%s3723_s25 + $0x380] sm:$0xff] %v2007_v56  ;;  %v2125_v19 = vld [vmem:[%s2800_s5 + $0x2b8] sm:$0xff]  ;;  %v2127_v29 = vld [vmem:[%s2800_s5 + $0x2c0] sm:$0xff]  ;;  %v2129_v23 = vld [vmem:[%s2800_s5 + $0x2c8] sm:$0xff] }
 0x1c0   : > { %2010 = vst [vmem:[%s3723_s25 + $0x3a0] sm:$0xff] %v2009_v4  ;;  %v2131_v51 = vld [vmem:[%s2800_s5 + $0x2d0] sm:$0xff]  ;;  %v2133_v62 = vld [vmem:[%s2800_s5 + $0x2d8] sm:$0xff]  ;;  %v2135_v56 = vld [vmem:[%s2800_s5 + $0x2e0] sm:$0xff] }
 0x1c1   : > { %2012 = vst [vmem:[%s3723_s25 + $0x3c0] sm:$0xff] %v2011_v59  ;;  %v2137_v4 = vld [vmem:[%s2800_s5 + $0x2e8] sm:$0xff]  ;;  %v2139_v59 = vld [vmem:[%s2800_s5 + $0x2f0] sm:$0xff] }
 0x1c2   : > { %2014 = vst [vmem:[%s3723_s25 + $0x3e0] sm:$0xff] %v2013_v50  ;;  %v2141_v50 = vld [vmem:[%s2800_s5 + $0x2f8] sm:$0xff] }
 0x1c3   : > { %2016 = vst [vmem:[%s3723_s25 + $0x400] sm:$0xff] %v2015_v17  ;;  %v2143_v17 = vld [vmem:[%s2800_s5 + $0x300] sm:$0xff] }
 0x1c4   : > { %2018 = vst [vmem:[%s3723_s25 + $0x420] sm:$0xff] %v2017_v37  ;;  %v2145_v37 = vld [vmem:[%s2800_s5 + $0x308] sm:$0xff] }
 0x1c5   : > { %2020 = vst [vmem:[%s3723_s25 + $0x440] sm:$0xff] %v2019_v24  ;;  %v2147_v24 = vld [vmem:[%s2800_s5 + $0x310] sm:$0xff] }
 0x1c6   : > { %2022 = vst [vmem:[%s3723_s25 + $0x460] sm:$0xff] %v2021_v25  ;;  %v2149_v25 = vld [vmem:[%s2800_s5 + $0x318] sm:$0xff] }
 0x1c7   : > { %2024 = vst [vmem:[%s3723_s25 + $0x480] sm:$0xff] %v2023_v20  ;;  %v2151_v20 = vld [vmem:[%s2800_s5 + $0x320] sm:$0xff] }
 0x1c8   : > { %2026 = vst [vmem:[%s3723_s25 + $0x4a0] sm:$0xff] %v2025_v3  ;;  %v2153_v3 = vld [vmem:[%s2800_s5 + $0x328] sm:$0xff] }
 0x1c9   : > { %2028 = vst [vmem:[%s3723_s25 + $0x4c0] sm:$0xff] %v2027_v2  ;;  %v2155_v2 = vld [vmem:[%s2800_s5 + $0x330] sm:$0xff] }
 0x1ca   : > { %2030 = vst [vmem:[%s3723_s25 + $0x4e0] sm:$0xff] %v2029_v27  ;;  %v2157_v27 = vld [vmem:[%s2800_s5 + $0x338] sm:$0xff] }
 0x1cb   : > { %2032 = vst [vmem:[%s3723_s25 + $0x500] sm:$0xff] %v2031_v1  ;;  %v2159_v1 = vld [vmem:[%s2800_s5 + $0x340] sm:$0xff] }
 0x1cc   : > { %2034 = vst [vmem:[%s3723_s25 + $0x520] sm:$0xff] %v2033_v32  ;;  %v2161_v32 = vld [vmem:[%s2800_s5 + $0x348] sm:$0xff] }
 0x1cd   : > { %2036 = vst [vmem:[%s3723_s25 + $0x540] sm:$0xff] %v2035_v0  ;;  %v2163_v0 = vld [vmem:[%s2800_s5 + $0x350] sm:$0xff] }
 0x1ce   : > { %2038 = vst [vmem:[%s3723_s25 + $0x560] sm:$0xff] %v2037_v49  ;;  %v2165_v49 = vld [vmem:[%s2800_s5 + $0x358] sm:$0xff] }
 0x1cf   : > { %2040 = vst [vmem:[%s3723_s25 + $0x580] sm:$0xff] %v2039_v35  ;;  %v2167_v35 = vld [vmem:[%s2800_s5 + $0x360] sm:$0xff] }
 0x1d0   : > { %2042 = vst [vmem:[%s3723_s25 + $0x5a0] sm:$0xff] %v2041_v6  ;;  %v2169_v6 = vld [vmem:[%s2800_s5 + $0x368] sm:$0xff] }
 0x1d1   : > { %2044 = vst [vmem:[%s3723_s25 + $0x5c0] sm:$0xff] %v2043_v60  ;;  %v2171_v60 = vld [vmem:[%s2800_s5 + $0x370] sm:$0xff] }
 0x1d2   : > { %2046 = vst [vmem:[%s3723_s25 + $0x5e0] sm:$0xff] %v2045_v15  ;;  %v2173_v15 = vld [vmem:[%s2800_s5 + $0x378] sm:$0xff] }
 0x1d3   : > { %2048 = vst [vmem:[%s3723_s25 + $0x600] sm:$0xff] %v2047_v58 }
 0x1d4   : > { %2050 = vst [vmem:[%s3723_s25 + $0x620] sm:$0xff] %v2049_v14 }
 0x1d5   : > { %2052 = vst [vmem:[%s3723_s25 + $0x640] sm:$0xff] %v2051_v53 }
 0x1d6   : > { %2054 = vst [vmem:[%s3723_s25 + $0x660] sm:$0xff] %v2053_v48 }
 0x1d7   : > { %2056 = vst [vmem:[%s3723_s25 + $0x680] sm:$0xff] %v2055_v13 }
 0x1d8   : > { %2058 = vst [vmem:[%s3723_s25 + $0x6a0] sm:$0xff] %v2057_v52 }
 0x1d9   : > { %2060 = vst [vmem:[%s3723_s25 + $0x6c0] sm:$0xff] %v2059_v12 }
 0x1da   : > { %2062 = vst [vmem:[%s3723_s25 + $0x6e0] sm:$0xff] %v2061_v28 }
 0x1db   : > { %2064 = vst [vmem:[%s3723_s25 + $0x700] sm:$0xff] %v2063_v30 }
 0x1dc   : > { %2066 = vst [vmem:[%s3723_s25 + $0x720] sm:$0xff] %v2065_v26 }
 0x1dd   : > { %2068 = vst [vmem:[%s3723_s25 + $0x740] sm:$0xff] %v2067_v16 }
 0x1de   : > { %2070 = vst [vmem:[%s3723_s25 + $0x760] sm:$0xff] %v2069_v39 }
 0x1df   : > { %2072 = vst [vmem:[%s3723_s25 + $0x780] sm:$0xff] %v2071_v5 }
 0x1e0   : > { %2074 = vst [vmem:[%s3723_s25 + $0x7a0] sm:$0xff] %v2073_v21 }
 0x1e1   : > { %2076 = vst [vmem:[%s3723_s25 + $0x7c0] sm:$0xff] %v2075_v40 }
 0x1e2   : > { %2078 = vst [vmem:[%s3723_s25 + $0x7e0] sm:$0xff] %v2077_v41 }
 0x1e3   : > { %2080 = vst [vmem:[%s3723_s25 + $0x800] sm:$0xff] %v2079_v42 }
 0x1e4   : > { %2082 = vst [vmem:[%s3723_s25 + $0x820] sm:$0xff] %v2081_v43 }
 0x1e5   : > { %2084 = vst [vmem:[%s3723_s25 + $0x840] sm:$0xff] %v2083_v11 }
 0x1e6   : > { %2086 = vst [vmem:[%s3723_s25 + $0x860] sm:$0xff] %v2085_v9 }
 0x1e7   : > { %2088 = vst [vmem:[%s3723_s25 + $0x880] sm:$0xff] %v2087_v47 }
 0x1e8   : > { %2090 = vst [vmem:[%s3723_s25 + $0x8a0] sm:$0xff] %v2089_v38 }
 0x1e9   : > { %2092 = vst [vmem:[%s3723_s25 + $0x8c0] sm:$0xff] %v2091_v63 }
 0x1ea   : > { %2094 = vst [vmem:[%s3723_s25 + $0x8e0] sm:$0xff] %v2093_v36 }
 0x1eb   : > { %2096 = vst [vmem:[%s3723_s25 + $0x900] sm:$0xff] %v2095_v7 }
 0x1ec   : > { %2098 = vst [vmem:[%s3723_s25 + $0x920] sm:$0xff] %v2097_v8 }
 0x1ed   : > { %2100 = vst [vmem:[%s3723_s25 + $0x940] sm:$0xff] %v2099_v18 }
 0x1ee   : > { %2102 = vst [vmem:[%s3723_s25 + $0x960] sm:$0xff] %v2101_v61 }
 0x1ef   : > { %2104 = vst [vmem:[%s3723_s25 + $0x980] sm:$0xff] %v2103_v57 }
 0x1f0   : > { %2106 = vst [vmem:[%s3723_s25 + $0x9a0] sm:$0xff] %v2105_v34 }
 0x1f1   : > { %2108 = vst [vmem:[%s3723_s25 + $0x9c0] sm:$0xff] %v2107_v55 }
 0x1f2   : > { %2110 = vst [vmem:[%s3723_s25 + $0x9e0] sm:$0xff] %v2109_v22 }
 0x1f3   : > { %2112 = vst [vmem:[%s3723_s25 + $0xa00] sm:$0xff] %v2111_v31 }
 0x1f4   : > { %2114 = vst [vmem:[%s3723_s25 + $0xa20] sm:$0xff] %v2113_v46 }
 0x1f5   : > { %2116 = vst [vmem:[%s3723_s25 + $0xa40] sm:$0xff] %v2115_v10 }
 0x1f6   : > { %2118 = vst [vmem:[%s3723_s25 + $0xa60] sm:$0xff] %v2117_v54 }
 0x1f7   : > { %2120 = vst [vmem:[%s3723_s25 + $0xa80] sm:$0xff] %v2119_v33 }
 0x1f8   : > { %2122 = vst [vmem:[%s3723_s25 + $0xaa0] sm:$0xff] %v2121_v45 }
 0x1f9   : > { %2124 = vst [vmem:[%s3723_s25 + $0xac0] sm:$0xff] %v2123_v44 }
 0x1fa   : > { %2126 = vst [vmem:[%s3723_s25 + $0xae0] sm:$0xff] %v2125_v19 }
 0x1fb   : > { %2128 = vst [vmem:[%s3723_s25 + $0xb00] sm:$0xff] %v2127_v29 }
 0x1fc   : > { %2130 = vst [vmem:[%s3723_s25 + $0xb20] sm:$0xff] %v2129_v23 }
 0x1fd   : > { %2132 = vst [vmem:[%s3723_s25 + $0xb40] sm:$0xff] %v2131_v51 }
 0x1fe   : > { %2134 = vst [vmem:[%s3723_s25 + $0xb60] sm:$0xff] %v2133_v62 }
 0x1ff   : > { %2136 = vst [vmem:[%s3723_s25 + $0xb80] sm:$0xff] %v2135_v56 }
 0x200   : > { %2138 = vst [vmem:[%s3723_s25 + $0xba0] sm:$0xff] %v2137_v4 }
 0x201   : > { %2140 = vst [vmem:[%s3723_s25 + $0xbc0] sm:$0xff] %v2139_v59 }
 0x202   : > { %2142 = vst [vmem:[%s3723_s25 + $0xbe0] sm:$0xff] %v2141_v50 }
 0x203   : > { %2144 = vst [vmem:[%s3723_s25 + $0xc00] sm:$0xff] %v2143_v17 }
 0x204   : > { %2146 = vst [vmem:[%s3723_s25 + $0xc20] sm:$0xff] %v2145_v37 }
 0x205   : > { %2148 = vst [vmem:[%s3723_s25 + $0xc40] sm:$0xff] %v2147_v24 }
 0x206   : > { %2150 = vst [vmem:[%s3723_s25 + $0xc60] sm:$0xff] %v2149_v25 }
 0x207   : > { %2152 = vst [vmem:[%s3723_s25 + $0xc80] sm:$0xff] %v2151_v20 }
 0x208   : > { %2154 = vst [vmem:[%s3723_s25 + $0xca0] sm:$0xff] %v2153_v3 }
 0x209   : > { %2156 = vst [vmem:[%s3723_s25 + $0xcc0] sm:$0xff] %v2155_v2 }
 0x20a   : > { %2158 = vst [vmem:[%s3723_s25 + $0xce0] sm:$0xff] %v2157_v27 }
 0x20b   : > { %2160 = vst [vmem:[%s3723_s25 + $0xd00] sm:$0xff] %v2159_v1 }
 0x20c   : > { %2162 = vst [vmem:[%s3723_s25 + $0xd20] sm:$0xff] %v2161_v32 }
 0x20d   : > { %2164 = vst [vmem:[%s3723_s25 + $0xd40] sm:$0xff] %v2163_v0 }
 0x20e   : > { %2166 = vst [vmem:[%s3723_s25 + $0xd60] sm:$0xff] %v2165_v49 }
 0x20f   : > { %2168 = vst [vmem:[%s3723_s25 + $0xd80] sm:$0xff] %v2167_v35 }
 0x210   : > { %2170 = vst [vmem:[%s3723_s25 + $0xda0] sm:$0xff] %v2169_v6 }
 0x211   : > { %2172 = vst [vmem:[%s3723_s25 + $0xdc0] sm:$0xff] %v2171_v60 }
 0x212   : > { %2174 = vst [vmem:[%s3723_s25 + $0xde0] sm:$0xff] %v2173_v15 }
 0x213 PF: > { %p11_p13 = scmp.ge.s32.totalorder %s2480_s19, 6   ;;  %s3964_s15 = smov %s2421_s16 }
 0x214   : > { %s3965_s16 = smov %s2490_s22  ;;  %s3966_s17 = smov %s2480_s19 }
 0x215   :  { %13 = sbr.rel (!%p11_p13) target bundleno = 2 (0x2), region = 242 }

</bundles_post_ra>
